<compile_context>
chip_gen: v5e
topology: v5e:2x2
jax: 0.10.0
libtpu: 0.0.40
codegen_flags: <defaults>
</compile_context>

<pallas_src>
import functools

import jax
import jax.numpy as jnp
from jax.experimental import pallas as pl
from jax.experimental.pallas import tpu as pltpu


C_OUT = 128   # branch output channels
C_MID = 160   # bottom-branch middle channels


def _conv_block_kernel(x_ref,
                       wt_ref, bt_ref,      # top branch:     (C_OUT, Cin) f32, (C_OUT, 1) f32
                       w1_ref, b1_ref,      # bottom stage 1: (C_OUT, Cin) f32, (C_OUT, 1) f32
                       w2_ref, b2_ref,      # bottom stage 2: (C_MID, C_OUT) bf16, (C_MID, 1) f32
                       w3_ref, b3_ref,      # bottom stage 3: (C_OUT, C_MID) bf16, (C_OUT, 1) f32
                       o_ref):
    x = x_ref[0].astype(jnp.float32)                      # (Cin, tm)
    cin, tm = x.shape

    # ---- First layer of both branches (K = Cin, tiny): VPU broadcast MACs. ----
    wt = wt_ref[...]                                      # (C_OUT, Cin) f32
    w1 = w1_ref[...]                                      # (C_OUT, Cin) f32
    top = jnp.broadcast_to(bt_ref[...], (C_OUT, tm))      # bias-initialized accumulators
    h1 = jnp.broadcast_to(b1_ref[...], (C_OUT, tm))
    for k in range(cin):                                  # static, unrolled (Cin small)
        xk = x[k:k + 1, :]                                # (1, tm) row, sublane-broadcast
        top = top + wt[:, k:k + 1] * xk                   # (C_OUT,1) col, lane-broadcast
        h1 = h1 + w1[:, k:k + 1] * xk
    top = jnp.maximum(top, 0.0)                           # ReLU; Dropout(0.2) = identity (eval)
    h1 = jnp.maximum(h1, 0.0)

    # ---- Bottom branch stages 2 and 3: bf16 MXU matmuls, f32 accumulation. ----
    h2 = jnp.dot(w2_ref[...], h1.astype(jnp.bfloat16),
                 preferred_element_type=jnp.float32) + b2_ref[...]
    h2 = jnp.maximum(h2, 0.0)                             # (C_MID, tm)
    bot = jnp.dot(w3_ref[...], h2.astype(jnp.bfloat16),
                  preferred_element_type=jnp.float32) + b3_ref[...]
    bot = jnp.maximum(bot, 0.0)                           # (C_OUT, tm)

    o_ref[0] = (top + bot).astype(o_ref.dtype)            # lane-dense (128, tm) store


def _fold_bn(w, b, gamma, beta, mean, var, eps=1e-5):
    """Fold eval-mode BatchNorm into an effective (out,in) weight and (out,1) bias."""
    scale = gamma / jnp.sqrt(var + eps)
    w_eff = w * scale[:, None]
    b_eff = (b - mean) * scale + beta
    return w_eff, b_eff.reshape(-1, 1)


def _round_up(a, b):
    return -(-a // b) * b


def _plan_tiles(hw, desired_tm, n_batch):
    """Pick a pixel-tile size (multiple of 128) and padded HW for a cdiv grid."""
    tm_cap = max(128, (min(desired_tm, _round_up(hw, 128)) // 128) * 128)
    n_tiles = -(-hw // tm_cap)
    # v7x megacore: prefer an even total number of parallel grid steps.
    if (n_batch * n_tiles) % 2 == 1 and hw > 128:
        n_tiles += 1
    tm = max(128, _round_up(-(-hw // n_tiles), 128))
    n_tiles = -(-hw // tm)
    return tm, n_tiles, n_tiles * tm


@functools.partial(jax.jit, static_argnames=("desired_tm", "out_dtype"))
def conv2d_block(x_nchw, params, desired_tm=1024, out_dtype=jnp.float32):
    """x_nchw: (N, Cin, H, W) float32. Returns (N, 128, H, W) in out_dtype (NCHW)."""
    N, Cin, H, W = x_nchw.shape
    HW = H * W
    tm, n_tiles, hw_pad = _plan_tiles(HW, desired_tm, N)

    (wt, bt), (w1, b1), (w2, b2), (w3, b3) = params       # w: (out, in), b: (out, 1), all f32
    w2b = w2.astype(jnp.bfloat16)                         # deep matmul weights -> native MXU rate
    w3b = w3.astype(jnp.bfloat16)

    x3 = x_nchw.reshape(N, Cin, HW)                       # free reshape, stays NCHW
    if hw_pad != HW:
        # 1x1 conv is pointwise over pixels: zero-padded columns are independent
        # and sliced off below, so a padded cdiv grid is exact.
        x3 = jnp.pad(x3, ((0, 0), (0, 0), (0, hw_pad - HW)))

    full = lambda arr: pl.BlockSpec(arr.shape, lambda n, t: (0, 0))

    flops = 2 * N * hw_pad * (2 * Cin * C_OUT + C_OUT * C_MID + C_MID * C_OUT)
    out_bytes = jnp.dtype(out_dtype).itemsize
    bytes_accessed = (4 * N * hw_pad * Cin + out_bytes * N * hw_pad * C_OUT
                      + 4 * (wt.size + w1.size + bt.size + b1.size + b2.size + b3.size)
                      + 2 * (w2b.size + w3b.size))

    out3 = pl.pallas_call(
        _conv_block_kernel,
        out_shape=jax.ShapeDtypeStruct((N, C_OUT, hw_pad), out_dtype),
        grid_spec=pltpu.PrefetchScalarGridSpec(
            num_scalar_prefetch=0,
            grid=(N, n_tiles),
            in_specs=[
                pl.BlockSpec((1, Cin, tm), lambda n, t: (n, 0, t)),
                full(wt), full(bt),
                full(w1), full(b1),
                full(w2b), full(b2),
                full(w3b), full(b3),
            ],
            out_specs=pl.BlockSpec((1, C_OUT, tm), lambda n, t: (n, 0, t)),
        ),
        compiler_params=pltpu.CompilerParams(
            dimension_semantics=("parallel", "parallel"),
            vmem_limit_bytes=32 * 1024 * 1024,
        ),
        cost_estimate=pl.CostEstimate(
            flops=flops, transcendentals=0, bytes_accessed=bytes_accessed),
    )(x3, wt, bt, w1, b1, w2b, b2, w3b, b3)

    if hw_pad != HW:
        out3 = out3[:, :, :HW]
    return out3.reshape(N, C_OUT, H, W)                   # free reshape, already NCHW


def _init_conv_bn(key, cin, cout):
    """Deterministic conv(1x1)+BN parameters, BN folded into (w_eff, b_eff)."""
    k = jax.random.split(key, 6)
    w = jax.random.normal(k[0], (cout, cin), jnp.float32) * 0.1     # PyTorch (out, in)
    b = jax.random.normal(k[1], (cout,), jnp.float32) * 0.1
    gamma = 1.0 + 0.1 * jax.random.normal(k[2], (cout,), jnp.float32)
    beta = 0.1 * jax.random.normal(k[3], (cout,), jnp.float32)
    mean = 0.1 * jax.random.normal(k[4], (cout,), jnp.float32)
    var = jax.random.uniform(k[5], (cout,), jnp.float32, 0.5, 1.5)
    return _fold_bn(w, b, gamma, beta, mean, var)


def make_params(key, n_features):
    k_top, k_b1, k_b2, k_b3 = jax.random.split(key, 4)
    return (
        _init_conv_bn(k_top, n_features, C_OUT),   # top branch
        _init_conv_bn(k_b1, n_features, C_OUT),    # bottom stage 1
        _init_conv_bn(k_b2, C_OUT, C_MID),         # bottom stage 2
        _init_conv_bn(k_b3, C_MID, C_OUT),         # bottom stage 3
    )


def _reference(x_nchw, params):
    """Pure-JAX f32 reference (eval-mode Conv2DBlock forward)."""
    (wt, bt), (w1, b1), (w2, b2), (w3, b3) = params
    xh = jnp.transpose(x_nchw, (0, 2, 3, 1))                # NHWC
    layer = lambda h, w, b: jax.nn.relu(h @ w.T + b[:, 0])
    top = layer(xh, wt, bt)
    h = layer(xh, w1, b1)
    h = layer(h, w2, b2)
    bot = layer(h, w3, b3)
    return jnp.transpose(top + bot, (0, 3, 1, 2))           # NCHW


if __name__ == "__main__":
    key = jax.random.PRNGKey(0)
    k_x, k_x2, k_p = jax.random.split(key, 3)

    n_features = 4
    params = make_params(k_p, n_features)

    # Spatial size implied by FullModel's pooling (kernel_size 11 squeezes): 11x11.
    # HW = 121 is not a multiple of 128 -> exercises the padded cdiv tail-tile path.
    N, H, W = 2, 11, 11
    x = jax.random.normal(k_x, (N, n_features, H, W), jnp.float32)
    out = jax.block_until_ready(conv2d_block(x, params))
    ref = _reference(x, params)
    assert out.shape == (N, 128, H, W)
    # bf16 matmuls -> loosened tolerance vs the f32 reference.
    assert jnp.allclose(out, ref, atol=3e-2, rtol=3e-2), float(jnp.max(jnp.abs(out - ref)))

    # Exactly-tiled spatial size (no padding fast path).
    N2, H2, W2 = 2, 16, 16
    x2 = jax.random.normal(k_x2, (N2, n_features, H2, W2), jnp.float32)
    out2 = jax.block_until_ready(conv2d_block(x2, params))
    ref2 = _reference(x2, params)
    assert out2.shape == (N2, 128, H2, W2)
    assert jnp.allclose(out2, ref2, atol=3e-2, rtol=3e-2), float(jnp.max(jnp.abs(out2 - ref2)))

    print("KERNEL_OK")
</pallas_src>

<mosaic_0001>
module attributes {stable_mosaic.version = 11 : i64} {
  func.func @_conv_block_kernel(%arg0: i32, %arg1: i32, %arg2: memref<1x4x128xf32, #tpu.memory_space<vmem>>, %arg3: memref<128x4xf32, #tpu.memory_space<vmem>>, %arg4: memref<128x1xf32, #tpu.memory_space<vmem>>, %arg5: memref<128x4xf32, #tpu.memory_space<vmem>>, %arg6: memref<128x1xf32, #tpu.memory_space<vmem>>, %arg7: memref<160x128xbf16, #tpu.memory_space<vmem>>, %arg8: memref<160x1xf32, #tpu.memory_space<vmem>>, %arg9: memref<128x160xbf16, #tpu.memory_space<vmem>>, %arg10: memref<128x1xf32, #tpu.memory_space<vmem>>, %arg11: memref<1x128x128xf32, #tpu.memory_space<vmem>>) attributes {dimension_semantics = [#tpu.dimension_semantics<parallel>, #tpu.dimension_semantics<parallel>], iteration_bounds = array<i64: 2, 1>, scalar_prefetch = 0 : i64, scratch_operands = 0 : i64, tpu.core_type = #tpu.core_type<tc>, window_params = [{transform_indices = @transform_0, window_bounds = array<i64: 1, 4, 128>}, {pipeline_mode = #tpu.pipeline_mode<synchronous>, transform_indices = @transform_1, window_bounds = array<i64: 128, 4>}, {pipeline_mode = #tpu.pipeline_mode<synchronous>, transform_indices = @transform_2, window_bounds = array<i64: 128, 1>}, {pipeline_mode = #tpu.pipeline_mode<synchronous>, transform_indices = @transform_3, window_bounds = array<i64: 128, 4>}, {pipeline_mode = #tpu.pipeline_mode<synchronous>, transform_indices = @transform_4, window_bounds = array<i64: 128, 1>}, {pipeline_mode = #tpu.pipeline_mode<synchronous>, transform_indices = @transform_5, window_bounds = array<i64: 160, 128>}, {pipeline_mode = #tpu.pipeline_mode<synchronous>, transform_indices = @transform_6, window_bounds = array<i64: 160, 1>}, {pipeline_mode = #tpu.pipeline_mode<synchronous>, transform_indices = @transform_7, window_bounds = array<i64: 128, 160>}, {pipeline_mode = #tpu.pipeline_mode<synchronous>, transform_indices = @transform_8, window_bounds = array<i64: 128, 1>}, {transform_indices = @transform_9, window_bounds = array<i64: 1, 128, 128>}]} {
    %c0 = arith.constant 0 : index
    %c0_0 = arith.constant 0 : index
    %c0_1 = arith.constant 0 : index
    %0 = vector.load %arg2[%c0, %c0_0, %c0_1] : memref<1x4x128xf32, #tpu.memory_space<vmem>>, vector<1x4x128xf32>
    %1 = vector.shape_cast %0 : vector<1x4x128xf32> to vector<4x128xf32>
    %c0_2 = arith.constant 0 : index
    %c0_3 = arith.constant 0 : index
    %2 = vector.load %arg3[%c0_2, %c0_3] : memref<128x4xf32, #tpu.memory_space<vmem>>, vector<128x4xf32>
    %c0_4 = arith.constant 0 : index
    %c0_5 = arith.constant 0 : index
    %3 = vector.load %arg5[%c0_4, %c0_5] : memref<128x4xf32, #tpu.memory_space<vmem>>, vector<128x4xf32>
    %c0_6 = arith.constant 0 : index
    %c0_7 = arith.constant 0 : index
    %4 = vector.load %arg4[%c0_6, %c0_7] : memref<128x1xf32, #tpu.memory_space<vmem>>, vector<128x1xf32>
    %5 = vector.shape_cast %4 : vector<128x1xf32> to vector<128x1xf32>
    %6 = vector.broadcast %5 : vector<128x1xf32> to vector<128x128xf32>
    %c0_8 = arith.constant 0 : index
    %c0_9 = arith.constant 0 : index
    %7 = vector.load %arg6[%c0_8, %c0_9] : memref<128x1xf32, #tpu.memory_space<vmem>>, vector<128x1xf32>
    %8 = vector.shape_cast %7 : vector<128x1xf32> to vector<128x1xf32>
    %9 = vector.broadcast %8 : vector<128x1xf32> to vector<128x128xf32>
    %10 = vector.extract_strided_slice %1 {offsets = [0, 0], sizes = [1, 128], strides = [1, 1]} : vector<4x128xf32> to vector<1x128xf32>
    %11 = vector.extract_strided_slice %2 {offsets = [0, 0], sizes = [128, 1], strides = [1, 1]} : vector<128x4xf32> to vector<128x1xf32>
    %12 = vector.broadcast %11 : vector<128x1xf32> to vector<128x128xf32>
    %13 = vector.broadcast %10 : vector<1x128xf32> to vector<128x128xf32>
    %14 = arith.mulf %12, %13 : vector<128x128xf32>
    %15 = arith.addf %6, %14 : vector<128x128xf32>
    %16 = vector.extract_strided_slice %3 {offsets = [0, 0], sizes = [128, 1], strides = [1, 1]} : vector<128x4xf32> to vector<128x1xf32>
    %17 = vector.broadcast %16 : vector<128x1xf32> to vector<128x128xf32>
    %18 = vector.broadcast %10 : vector<1x128xf32> to vector<128x128xf32>
    %19 = arith.mulf %17, %18 : vector<128x128xf32>
    %20 = arith.addf %9, %19 : vector<128x128xf32>
    %21 = vector.extract_strided_slice %1 {offsets = [1, 0], sizes = [1, 128], strides = [1, 1]} : vector<4x128xf32> to vector<1x128xf32>
    %22 = vector.extract_strided_slice %2 {offsets = [0, 1], sizes = [128, 1], strides = [1, 1]} : vector<128x4xf32> to vector<128x1xf32>
    %23 = vector.broadcast %22 : vector<128x1xf32> to vector<128x128xf32>
    %24 = vector.broadcast %21 : vector<1x128xf32> to vector<128x128xf32>
    %25 = arith.mulf %23, %24 : vector<128x128xf32>
    %26 = arith.addf %15, %25 : vector<128x128xf32>
    %27 = vector.extract_strided_slice %3 {offsets = [0, 1], sizes = [128, 1], strides = [1, 1]} : vector<128x4xf32> to vector<128x1xf32>
    %28 = vector.broadcast %27 : vector<128x1xf32> to vector<128x128xf32>
    %29 = vector.broadcast %21 : vector<1x128xf32> to vector<128x128xf32>
    %30 = arith.mulf %28, %29 : vector<128x128xf32>
    %31 = arith.addf %20, %30 : vector<128x128xf32>
    %32 = vector.extract_strided_slice %1 {offsets = [2, 0], sizes = [1, 128], strides = [1, 1]} : vector<4x128xf32> to vector<1x128xf32>
    %33 = vector.extract_strided_slice %2 {offsets = [0, 2], sizes = [128, 1], strides = [1, 1]} : vector<128x4xf32> to vector<128x1xf32>
    %34 = vector.broadcast %33 : vector<128x1xf32> to vector<128x128xf32>
    %35 = vector.broadcast %32 : vector<1x128xf32> to vector<128x128xf32>
    %36 = arith.mulf %34, %35 : vector<128x128xf32>
    %37 = arith.addf %26, %36 : vector<128x128xf32>
    %38 = vector.extract_strided_slice %3 {offsets = [0, 2], sizes = [128, 1], strides = [1, 1]} : vector<128x4xf32> to vector<128x1xf32>
    %39 = vector.broadcast %38 : vector<128x1xf32> to vector<128x128xf32>
    %40 = vector.broadcast %32 : vector<1x128xf32> to vector<128x128xf32>
    %41 = arith.mulf %39, %40 : vector<128x128xf32>
    %42 = arith.addf %31, %41 : vector<128x128xf32>
    %43 = vector.extract_strided_slice %1 {offsets = [3, 0], sizes = [1, 128], strides = [1, 1]} : vector<4x128xf32> to vector<1x128xf32>
    %44 = vector.extract_strided_slice %2 {offsets = [0, 3], sizes = [128, 1], strides = [1, 1]} : vector<128x4xf32> to vector<128x1xf32>
    %45 = vector.broadcast %44 : vector<128x1xf32> to vector<128x128xf32>
    %46 = vector.broadcast %43 : vector<1x128xf32> to vector<128x128xf32>
    %47 = arith.mulf %45, %46 : vector<128x128xf32>
    %48 = arith.addf %37, %47 : vector<128x128xf32>
    %49 = vector.extract_strided_slice %3 {offsets = [0, 3], sizes = [128, 1], strides = [1, 1]} : vector<128x4xf32> to vector<128x1xf32>
    %50 = vector.broadcast %49 : vector<128x1xf32> to vector<128x128xf32>
    %51 = vector.broadcast %43 : vector<1x128xf32> to vector<128x128xf32>
    %52 = arith.mulf %50, %51 : vector<128x128xf32>
    %53 = arith.addf %42, %52 : vector<128x128xf32>
    %cst = arith.constant 0.000000e+00 : f32
    %54 = vector.broadcast %cst : f32 to vector<128x128xf32>
    %55 = arith.maximumf %48, %54 : vector<128x128xf32>
    %cst_10 = arith.constant 0.000000e+00 : f32
    %56 = vector.broadcast %cst_10 : f32 to vector<128x128xf32>
    %57 = arith.maximumf %53, %56 : vector<128x128xf32>
    %c0_11 = arith.constant 0 : index
    %c0_12 = arith.constant 0 : index
    %58 = vector.load %arg7[%c0_11, %c0_12] : memref<160x128xbf16, #tpu.memory_space<vmem>>, vector<160x128xbf16>
    %59 = arith.truncf %57 : vector<128x128xf32> to vector<128x128xbf16>
    %cst_13 = arith.constant dense<0.000000e+00> : vector<160x128xf32>
    %60 = tpu.matmul %58, %59, %cst_13 {dimension_numbers = #tpu.dot_dimension_numbers<[1], [0], [0], [1], [0, 0, 1, 1], [], []>} : vector<160x128xbf16>, vector<128x128xbf16>, vector<160x128xf32> -> vector<160x128xf32>
    %c0_14 = arith.constant 0 : index
    %c0_15 = arith.constant 0 : index
    %61 = vector.load %arg8[%c0_14, %c0_15] : memref<160x1xf32, #tpu.memory_space<vmem>>, vector<160x1xf32>
    %62 = vector.broadcast %61 : vector<160x1xf32> to vector<160x128xf32>
    %63 = arith.addf %60, %62 : vector<160x128xf32>
    %cst_16 = arith.constant 0.000000e+00 : f32
    %64 = vector.broadcast %cst_16 : f32 to vector<160x128xf32>
    %65 = arith.maximumf %63, %64 : vector<160x128xf32>
    %c0_17 = arith.constant 0 : index
    %c0_18 = arith.constant 0 : index
    %66 = vector.load %arg9[%c0_17, %c0_18] : memref<128x160xbf16, #tpu.memory_space<vmem>>, vector<128x160xbf16>
    %67 = arith.truncf %65 : vector<160x128xf32> to vector<160x128xbf16>
    %cst_19 = arith.constant dense<0.000000e+00> : vector<128x128xf32>
    %68 = tpu.matmul %66, %67, %cst_19 {dimension_numbers = #tpu.dot_dimension_numbers<[1], [0], [0], [1], [0, 0, 1, 1], [], []>} : vector<128x160xbf16>, vector<160x128xbf16>, vector<128x128xf32> -> vector<128x128xf32>
    %c0_20 = arith.constant 0 : index
    %c0_21 = arith.constant 0 : index
    %69 = vector.load %arg10[%c0_20, %c0_21] : memref<128x1xf32, #tpu.memory_space<vmem>>, vector<128x1xf32>
    %70 = vector.broadcast %69 : vector<128x1xf32> to vector<128x128xf32>
    %71 = arith.addf %68, %70 : vector<128x128xf32>
    %cst_22 = arith.constant 0.000000e+00 : f32
    %72 = vector.broadcast %cst_22 : f32 to vector<128x128xf32>
    %73 = arith.maximumf %71, %72 : vector<128x128xf32>
    %74 = arith.addf %55, %73 : vector<128x128xf32>
    %c0_23 = arith.constant 0 : index
    %c0_24 = arith.constant 0 : index
    %c0_25 = arith.constant 0 : index
    %75 = vector.load %arg11[%c0_23, %c0_24, %c0_25] : memref<1x128x128xf32, #tpu.memory_space<vmem>>, vector<1x128x128xf32>
    %76 = vector.shape_cast %75 : vector<1x128x128xf32> to vector<128x128xf32>
    %77 = vector.shape_cast %74 : vector<128x128xf32> to vector<1x128x128xf32>
    tpu.vector_store %arg11[%c0_23, %c0_24, %c0_25], %77 {strides = array<i32>} : memref<1x128x128xf32, #tpu.memory_space<vmem>>, vector<1x128x128xf32>,
    return
  }
  func.func @transform_0(%arg0: i32, %arg1: i32) -> (i32, i32, i32) {
    %c0_i32 = arith.constant 0 : i32
    %c0_i32_0 = arith.constant 0 : i32
    return %arg0, %c0_i32, %arg1 : i32, i32, i32
  }
  func.func @transform_1(%arg0: i32, %arg1: i32) -> (i32, i32) {
    %c0_i32 = arith.constant 0 : i32
    %c0_i32_0 = arith.constant 0 : i32
    %c0_i32_1 = arith.constant 0 : i32
    return %c0_i32, %c0_i32_0 : i32, i32
  }
  func.func @transform_2(%arg0: i32, %arg1: i32) -> (i32, i32) {
    %c0_i32 = arith.constant 0 : i32
    %c0_i32_0 = arith.constant 0 : i32
    %c0_i32_1 = arith.constant 0 : i32
    return %c0_i32, %c0_i32_0 : i32, i32
  }
  func.func @transform_3(%arg0: i32, %arg1: i32) -> (i32, i32) {
    %c0_i32 = arith.constant 0 : i32
    %c0_i32_0 = arith.constant 0 : i32
    %c0_i32_1 = arith.constant 0 : i32
    return %c0_i32, %c0_i32_0 : i32, i32
  }
  func.func @transform_4(%arg0: i32, %arg1: i32) -> (i32, i32) {
    %c0_i32 = arith.constant 0 : i32
    %c0_i32_0 = arith.constant 0 : i32
    %c0_i32_1 = arith.constant 0 : i32
    return %c0_i32, %c0_i32_0 : i32, i32
  }
  func.func @transform_5(%arg0: i32, %arg1: i32) -> (i32, i32) {
    %c0_i32 = arith.constant 0 : i32
    %c0_i32_0 = arith.constant 0 : i32
    %c0_i32_1 = arith.constant 0 : i32
    return %c0_i32, %c0_i32_0 : i32, i32
  }
  func.func @transform_6(%arg0: i32, %arg1: i32) -> (i32, i32) {
    %c0_i32 = arith.constant 0 : i32
    %c0_i32_0 = arith.constant 0 : i32
    %c0_i32_1 = arith.constant 0 : i32
    return %c0_i32, %c0_i32_0 : i32, i32
  }
  func.func @transform_7(%arg0: i32, %arg1: i32) -> (i32, i32) {
    %c0_i32 = arith.constant 0 : i32
    %c0_i32_0 = arith.constant 0 : i32
    %c0_i32_1 = arith.constant 0 : i32
    return %c0_i32, %c0_i32_0 : i32, i32
  }
  func.func @transform_8(%arg0: i32, %arg1: i32) -> (i32, i32) {
    %c0_i32 = arith.constant 0 : i32
    %c0_i32_0 = arith.constant 0 : i32
    %c0_i32_1 = arith.constant 0 : i32
    return %c0_i32, %c0_i32_0 : i32, i32
  }
  func.func @transform_9(%arg0: i32, %arg1: i32) -> (i32, i32, i32) {
    %c0_i32 = arith.constant 0 : i32
    %c0_i32_0 = arith.constant 0 : i32
    return %arg0, %c0_i32, %arg1 : i32, i32, i32
  }
}

</mosaic_0001>

<bundles_post_ra>
// kernel: conv2d_block.1
= control target key start
LH: loop header
LB: loop body
LE: loop exit
PB: predicated region body
PF: predicated region fallthrough
CT: control target
= control target key end

     0   :  { %s2474_s30 = smov 0   ;;  %s2476_s10 = smov 0   ;;  %s3849_s0 = inlined_call_operand.vmem [shape: f32[2,4,128], index: 0, kind: input, shape index: {}]   ;;  %s3850_s1 = inlined_call_operand.vmem [shape: f32[128,4], index: 1, kind: input, shape index: {}]   ;;  %s3851_s2 = inlined_call_operand.vmem [shape: f32[128,1], index: 2, kind: input, shape index: {}]   ;;  %s3852_s3 = inlined_call_operand.vmem [shape: f32[128,4], index: 3, kind: input, shape index: {}]   ;;  %s3853_s4 = inlined_call_operand.vmem [shape: f32[128,1], index: 4, kind: input, shape index: {}]   ;;  %s3854_s5 = inlined_call_operand.vmem [shape: bf16[160,128], index: 5, kind: input, shape index: {}]   ;;  %s3855_s6 = inlined_call_operand.vmem [shape: f32[160,1], index: 6, kind: input, shape index: {}]   ;;  %s3856_s7 = inlined_call_operand.vmem [shape: bf16[128,160], index: 7, kind: input, shape index: {}]   ;;  %s3857_s8 = inlined_call_operand.vmem [shape: f32[128,1], index: 8, kind: input, shape index: {}]   ;;  %s3858_s9 = inlined_call_operand.vmem [shape: f32[2,128,128], index: 9, kind: output, shape index: {}]  }
   0x1   :  { %s2478_s11 = smov 0  }
   0x2 LB: > { %s31_s12 = sadd.s32 1, %s2414_s10  ;;  %p2159_p0 = scmp.ge.s32.totalorder %s2418_s11, 1  ;;  %s2418_s11 = sphi %s2478_s11, %s19_s11   ;;  %s2414_s10 = sphi %s2476_s10, %s3964_s10   ;;  %s2410_s30 = sphi %s2474_s30, %s3963_s30  }
   0x3   : > { %p33_p1 = scmp.ge.s32.totalorder %s31_s12, 2  ;;  %p305_p2 = scmp.lt.s32.totalorder %s2418_s11, 3 }
   0x5   : > { %s3966_s12 = smov (%p33_p1, %s31_s12), 0  ;;  %p306_p3 = pnand %p2159_p0, %p305_p2 }
   0x7   : > { %309 = sbr.rel (%p306_p3) target bundleno = 1013 (0x3f5), region = 56 }
   0xc   : > { %v399_v0 = vld [vmem:[%s3851_s2 + $0x20] sm:$0xff]  ;;  %v397_v1 = vld [vmem:[%s3851_s2 + $0x10] sm:$0xff]  ;;  %v3859_v3 = vmov 0   ;;  %v400_v4 = vld [vmem:[%s3851_s2 + $0x28] sm:$0xff]  ;;  %p346_p4 = scmp.lt.s32.totalorder %s2410_s30, 1  ;;  %vm1904_vm0 = vcmask 261120  }
   0xd   : > { %v395_v2 = vld [vmem:[%s3851_s2] sm:$0xff]  ;;  %2350 = vset.pattern.permute.xlu2 %v3859_v3  ;;  %2349 = vset.pattern.permute.xlu1 %v3859_v3  ;;  %v398_v5 = vld [vmem:[%s3851_s2 + $0x18] sm:$0xff]  ;;  %v396_v6 = vld [vmem:[%s3851_s2 + $0x8] sm:$0xff] }
   0xe   : > { %2348 = vset.pattern.permute.xlu0 %v3859_v3  ;;  %433 = vperm.xlu2 %2350, %v399_v0   ;;  %v403_v7 = vld [vmem:[%s3851_s2 + $0x40] sm:$0xff]  ;;  %v402_v8 = vld [vmem:[%s3851_s2 + $0x38] sm:$0xff]  ;;  %v401_v9 = vld [vmem:[%s3851_s2 + $0x30] sm:$0xff]  ;;  %s3968_s30 = smov (!%p346_p4, %s2410_s30), 1 }
   0xf   : > { %423 = vperm.xlu1 %2349, %v397_v1   ;;  %413 = vperm.xlu0 %2348, %v395_v2   ;;  %v406_v10 = vld [vmem:[%s3851_s2 + $0x58] sm:$0xff]  ;;  %v405_v11 = vld [vmem:[%s3851_s2 + $0x50] sm:$0xff]  ;;  %v404_v12 = vld [vmem:[%s3851_s2 + $0x48] sm:$0xff]  ;;  %s2160_s22 = sshll.u32 %s3968_s30, 2  ;;  %s2277_s17 = sshll.u32 %s3968_s30, 7 }
  0x10   : > { %v409_v13 = vld [vmem:[%s3851_s2 + $0x70] sm:$0xff]  ;;  %v408_v14 = vld [vmem:[%s3851_s2 + $0x68] sm:$0xff]  ;;  %v407_v15 = vld [vmem:[%s3851_s2 + $0x60] sm:$0xff]  ;;  %s352_s25 = scalar_lea.vmem %s3849_s0, %s2160_s22  ;;  %s3766_s20 = scalar_lea.vmem %s3858_s9, %s2277_s17 }
  0x11   : > { %v492_v16 = vld [vmem:[%s3853_s4 + $0x8] sm:$0xff]  ;;  %v491_v17 = vld [vmem:[%s3853_s4] sm:$0xff]  ;;  %v410_v18 = vld [vmem:[%s3851_s2 + $0x78] sm:$0xff] }
  0x12   : > { %v495_v19 = vld [vmem:[%s3853_s4 + $0x20] sm:$0xff]  ;;  %v494_v20 = vld [vmem:[%s3853_s4 + $0x18] sm:$0xff]  ;;  %v493_v21 = vld [vmem:[%s3853_s4 + $0x10] sm:$0xff] }
  0x13   : > { %v498_v22 = vld [vmem:[%s3853_s4 + $0x38] sm:$0xff]  ;;  %v497_v23 = vld [vmem:[%s3853_s4 + $0x30] sm:$0xff]  ;;  %v496_v24 = vld [vmem:[%s3853_s4 + $0x28] sm:$0xff] }
  0x14   : > { %v501_v25 = vld [vmem:[%s3853_s4 + $0x50] sm:$0xff]  ;;  %v500_v26 = vld [vmem:[%s3853_s4 + $0x48] sm:$0xff]  ;;  %v499_v27 = vld [vmem:[%s3853_s4 + $0x40] sm:$0xff] }
  0x15   : > { %v504_v28 = vld [vmem:[%s3853_s4 + $0x68] sm:$0xff]  ;;  %v503_v29 = vld [vmem:[%s3853_s4 + $0x60] sm:$0xff]  ;;  %v502_v30 = vld [vmem:[%s3853_s4 + $0x58] sm:$0xff] }
  0x16   : > { %438 = vperm.xlu2 %2350, %v400_v4   ;;  %v2590_v31 = vld [vmem:[%s3850_s1] sm:$0xff]  ;;  %v506_v32 = vld [vmem:[%s3853_s4 + $0x78] sm:$0xff]  ;;  %v505_v33 = vld [vmem:[%s3853_s4 + $0x70] sm:$0xff] }
  0x17   : > { %428 = vperm.xlu1 %2349, %v398_v5   ;;  %418 = vperm.xlu0 %2348, %v396_v6   ;;  %3870 = vst [vmem:[#allocation2_spill] sm:$0xff] %v2590_v31  ;;  %v2602_v34 = vld [vmem:[%s3850_s1 + $0x18] sm:$0xff]  ;;  %v2607_v35 = vld [vmem:[%s3850_s1 + $0x10] sm:$0xff]  ;;  %v2612_v36 = vld [vmem:[%s3850_s1 + $0x8] sm:$0xff] }
  0x18   : > { %v2622_v38 = vld [vmem:[%s3850_s1 + $0x30] sm:$0xff]  ;;  %v2627_v39 = vld [vmem:[%s3850_s1 + $0x28] sm:$0xff]  ;;  %v2632_v40 = vld [vmem:[%s3850_s1 + $0x20] sm:$0xff] }
  0x19   : > { %v2642_v42 = vld [vmem:[%s3850_s1 + $0x48] sm:$0xff]  ;;  %v2647_v43 = vld [vmem:[%s3850_s1 + $0x40] sm:$0xff]  ;;  %v2652_v44 = vld [vmem:[%s3850_s1 + $0x38] sm:$0xff] }
  0x1a   : > { %v2662_v46 = vld [vmem:[%s3850_s1 + $0x60] sm:$0xff]  ;;  %v2667_v47 = vld [vmem:[%s3850_s1 + $0x58] sm:$0xff]  ;;  %v2672_v48 = vld [vmem:[%s3850_s1 + $0x50] sm:$0xff] }
  0x1b   : > { %3873 = vst [vmem:[#allocation5_spill] sm:$0xff] %v2662_v46  ;;  %v2686_v52 = vld [vmem:[%s3850_s1 + $0x78] sm:$0xff]  ;;  %v2691_v53 = vld [vmem:[%s3850_s1 + $0x70] sm:$0xff]  ;;  %v2696_v54 = vld [vmem:[%s3850_s1 + $0x68] sm:$0xff] }
  0x1c   : > { %3875 = vst [vmem:[#allocation7_spill] sm:$0xff] %v2686_v52  ;;  %v2710_v58 = vld [vmem:[%s3852_s3 + $0x10] sm:$0xff]  ;;  %v2715_v59 = vld [vmem:[%s3852_s3 + $0x8] sm:$0xff]  ;;  %v2720_v60 = vld [vmem:[%s3852_s3] sm:$0xff] }
  0x1d   : > { %3876 = vst [vmem:[#allocation8_spill] sm:$0xff] %v2691_v53  ;;  %v2734_v0 = vld [vmem:[%s3852_s3 + $0x28] sm:$0xff]  ;;  %v2739_v1 = vld [vmem:[%s3852_s3 + $0x20] sm:$0xff]  ;;  %v2744_v2 = vld [vmem:[%s3852_s3 + $0x18] sm:$0xff] }
  0x1e   : > { %453 = vperm.xlu2 %2350, %v403_v7   ;;  %v2758_v7 = vld [vmem:[%s3852_s3 + $0x40] sm:$0xff] }
  0x1f   : > { %448 = vperm.xlu1 %2349, %v402_v8   ;;  %443 = vperm.xlu0 %2348, %v401_v9   ;;  %v2763_v8 = vld [vmem:[%s3852_s3 + $0x38] sm:$0xff]  ;;  %v2768_v9 = vld [vmem:[%s3852_s3 + $0x30] sm:$0xff] }
  0x26   : > { %468 = vperm.xlu2 %2350, %v406_v10  }
  0x27   : > { %463 = vperm.xlu1 %2349, %v405_v11   ;;  %458 = vperm.xlu0 %2348, %v404_v12  }
  0x2e   : > { %483 = vperm.xlu2 %2350, %v409_v13   ;;  %v2782_v13 = vld [vmem:[%s3852_s3 + $0x58] sm:$0xff] }
  0x2f   : > { %478 = vperm.xlu1 %2349, %v408_v14   ;;  %473 = vperm.xlu0 %2348, %v407_v15   ;;  %v2787_v14 = vld [vmem:[%s3852_s3 + $0x50] sm:$0xff]  ;;  %v2792_v15 = vld [vmem:[%s3852_s3 + $0x48] sm:$0xff] }
  0x36   : > { %514 = vperm.xlu2 %2350, %v492_v16  }
  0x37   : > { %509 = vperm.xlu1 %2349, %v491_v17   ;;  %488 = vperm.xlu0 %2348, %v410_v18  }
  0x3e   : > { %529 = vperm.xlu2 %2350, %v495_v19   ;;  %v2806_v19 = vld [vmem:[%s3852_s3 + $0x70] sm:$0xff] }
  0x3f   : > { %524 = vperm.xlu1 %2349, %v494_v20   ;;  %519 = vperm.xlu0 %2348, %v493_v21   ;;  %v2811_v20 = vld [vmem:[%s3852_s3 + $0x68] sm:$0xff]  ;;  %v2816_v21 = vld [vmem:[%s3852_s3 + $0x60] sm:$0xff] }
  0x46   : > { %544 = vperm.xlu2 %2350, %v498_v22  }
  0x47   : > { %539 = vperm.xlu1 %2349, %v497_v23   ;;  %534 = vperm.xlu0 %2348, %v496_v24  }
  0x4e   : > { %559 = vperm.xlu2 %2350, %v501_v25   ;;  %v2830_v25 = vld [vmem:[%s3852_s3 + $0x78] sm:$0xff] }
  0x4f   : > { %554 = vperm.xlu1 %2349, %v500_v26   ;;  %549 = vperm.xlu0 %2348, %v499_v27   ;;  %v2421_v26 = vmov 1  }
  0x56   : > { %574 = vperm.xlu2 %2350, %v504_v28  }
  0x57   : > { %569 = vperm.xlu1 %2349, %v503_v29   ;;  %564 = vperm.xlu0 %2348, %v502_v30  }
  0x5e   : > { %589 = vperm.xlu2 %2350, %v2590_v31  }
  0x5f   : > { %584 = vperm.xlu1 %2349, %v506_v32   ;;  %579 = vperm.xlu0 %2348, %v505_v33  }
  0x66   : > { %604 = vperm.xlu2 %2350, %v2602_v34  }
  0x67   : > { %599 = vperm.xlu1 %2349, %v2607_v35   ;;  %594 = vperm.xlu0 %2348, %v2612_v36  }
  0x68   : > { %v2617_v37 = vpop.permute.xlu2 %433 }
  0x6e   : > { %619 = vperm.xlu2 %2350, %v2622_v38  }
  0x6f   : > { %614 = vperm.xlu1 %2349, %v2627_v39   ;;  %609 = vperm.xlu0 %2348, %v2632_v40  }
  0x70   : > { %v2637_v41 = vpop.permute.xlu2 %438 }
  0x71   : > { %3871 = vst [vmem:[#allocation3_spill] sm:$0xff] %v2637_v41 }
  0x76   : > { %634 = vperm.xlu2 %2350, %v2642_v42  }
  0x77   : > { %629 = vperm.xlu1 %2349, %v2647_v43   ;;  %624 = vperm.xlu0 %2348, %v2652_v44  }
  0x78   : > { %v2657_v45 = vpop.permute.xlu2 %453 }
  0x79   : > { %3872 = vst [vmem:[#allocation4_spill] sm:$0xff] %v2657_v45 }
  0x7e   : > { %649 = vperm.xlu2 %2350, %v2662_v46  }
  0x7f   : > { %644 = vperm.xlu1 %2349, %v2667_v47   ;;  %639 = vperm.xlu0 %2348, %v2672_v48  }
  0x80   : > { %v2677_v49 = vpop.permute.xlu2 %468 }
  0x81   : > { %3874 = vst [vmem:[#allocation6_spill] sm:$0xff] %v2677_v49  ;;  %v2679_v50 = vpop.permute.xlu1 %423  ;;  %v2681_v51 = vpop.permute.xlu0 %413 }
  0x86   : > { %664 = vperm.xlu2 %2350, %v2686_v52  }
  0x87   : > { %659 = vperm.xlu1 %2349, %v2691_v53   ;;  %654 = vperm.xlu0 %2348, %v2696_v54  }
  0x88   : > { %v2701_v55 = vpop.permute.xlu2 %483 }
  0x89   : > { %3877 = vst [vmem:[#allocation9_spill] sm:$0xff] %v2701_v55  ;;  %v2703_v56 = vpop.permute.xlu1 %428  ;;  %v2705_v57 = vpop.permute.xlu0 %418 }
  0x8e   : > { %712 = vperm.xlu2 %2350, %v2710_v58  }
  0x8f   : > { %707 = vperm.xlu1 %2349, %v2715_v59   ;;  %702 = vperm.xlu0 %2348, %v2720_v60  }
  0x90   : > { %v2725_v61 = vpop.permute.xlu2 %514 }
  0x91   : > { %3878 = vst [vmem:[#allocation10_spill] sm:$0xff] %v2725_v61  ;;  %v2727_v62 = vpop.permute.xlu1 %448  ;;  %v2729_v63 = vpop.permute.xlu0 %443 }
  0x92   : > { %3879 = vst [vmem:[#allocation11_spill] sm:$0xff] %v2729_v63 }
  0x96   : > { %727 = vperm.xlu2 %2350, %v2734_v0  }
  0x97   : > { %722 = vperm.xlu1 %2349, %v2739_v1   ;;  %717 = vperm.xlu0 %2348, %v2744_v2  }
  0x98   : > { %v2749_v4 = vpop.permute.xlu2 %529 }
  0x99   : > { %3880 = vst [vmem:[#allocation12_spill] sm:$0xff] %v2749_v4  ;;  %v2751_v5 = vpop.permute.xlu1 %463  ;;  %v2753_v6 = vpop.permute.xlu0 %458 }
  0x9a   : > { %3881 = vst [vmem:[#allocation13_spill] sm:$0xff] %v2753_v6 }
  0x9e   : > { %742 = vperm.xlu2 %2350, %v2758_v7  }
  0x9f   : > { %737 = vperm.xlu1 %2349, %v2763_v8   ;;  %732 = vperm.xlu0 %2348, %v2768_v9  }
  0xa0   : > { %v2773_v10 = vpop.permute.xlu2 %544 }
  0xa1   : > { %3882 = vst [vmem:[#allocation14_spill] sm:$0xff] %v2773_v10  ;;  %v2775_v11 = vpop.permute.xlu1 %478  ;;  %v2777_v12 = vpop.permute.xlu0 %473 }
  0xa2   : > { %3883 = vst [vmem:[#allocation15_spill] sm:$0xff] %v2777_v12 }
  0xa6   : > { %757 = vperm.xlu2 %2350, %v2782_v13  }
  0xa7   : > { %752 = vperm.xlu1 %2349, %v2787_v14   ;;  %747 = vperm.xlu0 %2348, %v2792_v15  }
  0xa8   : > { %v2797_v16 = vpop.permute.xlu2 %559 }
  0xa9   : > { %3884 = vst [vmem:[#allocation16_spill] sm:$0xff] %v2797_v16  ;;  %v2799_v17 = vpop.permute.xlu1 %509  ;;  %v2801_v18 = vpop.permute.xlu0 %488 }
  0xaa   : > { %3885 = vst [vmem:[#allocation17_spill] sm:$0xff] %v2801_v18 }
  0xae   : > { %772 = vperm.xlu2 %2350, %v2806_v19  }
  0xaf   : > { %767 = vperm.xlu1 %2349, %v2811_v20   ;;  %762 = vperm.xlu0 %2348, %v2816_v21  }
  0xb0   : > { %v2821_v22 = vpop.permute.xlu2 %574 }
  0xb1   : > { %3886 = vst [vmem:[#allocation18_spill] sm:$0xff] %v2821_v22  ;;  %v2823_v23 = vpop.permute.xlu1 %524  ;;  %v2825_v24 = vpop.permute.xlu0 %519 }
  0xb2   : > { %3887 = vst [vmem:[#allocation19_spill] sm:$0xff] %v2825_v24 }
  0xb6   : > { %2352 = vset.pattern.permute.xlu2 %v2421_v26 }
  0xb7   : > { %2351 = vset.pattern.permute.xlu1 %v2421_v26  ;;  %777 = vperm.xlu0 %2348, %v2830_v25  }
  0xb8   : > { %813 = vperm.xlu1 %2351, %v2590_v31   ;;  %817 = vperm.xlu2 %2352, %v2612_v36   ;;  %v2835_v27 = vpop.permute.xlu2 %589 }
  0xb9   : > { %v2837_v28 = vpop.permute.xlu1 %539  ;;  %v2839_v29 = vpop.permute.xlu0 %534 }
  0xba   : > { %3888 = vst [vmem:[#allocation20_spill] sm:$0xff] %v2839_v29 }
  0xbf   : > { %2353 = vset.pattern.permute.xlu0 %v2421_v26 }
  0xc0   : > { %821 = vperm.xlu0 %2353, %v2607_v35   ;;  %825 = vperm.xlu1 %2351, %v2602_v34   ;;  %v2843_v30 = vpop.permute.xlu2 %604 }
  0xc1   : > { %829 = vperm.xlu2 %2352, %v2632_v40   ;;  %v2846_v32 = vpop.permute.xlu1 %554  ;;  %v2848_v33 = vpop.permute.xlu0 %549 }
  0xc2   : > { %3889 = vst [vmem:[#allocation21_spill] sm:$0xff] %v2846_v32 }
  0xc3   : > { %3890 = vst [vmem:[#allocation22_spill] sm:$0xff] %v2848_v33 }
  0xc8   : > { %841 = vperm.xlu0 %2353, %v2652_v44   ;;  %833 = vperm.xlu1 %2351, %v2627_v39   ;;  %v2852_v3 = vpop.permute.xlu2 %619 }
  0xc9   : > { %3891 = vst [vmem:[#allocation23_spill] sm:$0xff] %v2852_v3  ;;  %837 = vperm.xlu2 %2352, %v2622_v38   ;;  %v2855_v26 = vpop.permute.xlu1 %569  ;;  %v2857_v55 = vpop.permute.xlu0 %564 }
  0xca   : > { %3892 = vst [vmem:[#allocation24_spill] sm:$0xff] %v2855_v26 }
  0xcb   : > { %3893 = vst [vmem:[#allocation25_spill] sm:$0xff] %v2857_v55 }
  0xd0   : > { %853 = vperm.xlu0 %2353, %v2672_v48   ;;  %845 = vperm.xlu1 %2351, %v2647_v43   ;;  %v2861_v49 = vpop.permute.xlu2 %634 }
  0xd1   : > { %3894 = vst [vmem:[#allocation26_spill] sm:$0xff] %v2861_v49  ;;  %849 = vperm.xlu2 %2352, %v2642_v42   ;;  %v2864_v45 = vpop.permute.xlu1 %584  ;;  %v2866_v18 = vpop.permute.xlu0 %579 }
  0xd8   : > { %865 = vperm.xlu0 %2353, %v2696_v54   ;;  %857 = vperm.xlu1 %2351, %v2667_v47   ;;  %v2870_v41 = vpop.permute.xlu2 %649 }
  0xd9   : > { %3895 = vst [vmem:[#allocation27_spill] sm:$0xff] %v2870_v41  ;;  %861 = vperm.xlu2 %2352, %v2662_v46   ;;  %v2873_v12 = vpop.permute.xlu1 %599  ;;  %v595_v61 = vpop.permute.xlu0 %594 }
  0xe0   : > { %910 = vperm.xlu0 %2353, %v2720_v60   ;;  %869 = vperm.xlu1 %2351, %v2691_v53   ;;  %v2877_v6 = vpop.permute.xlu2 %664 }
  0xe1   : > { %3896 = vst [vmem:[#allocation28_spill] sm:$0xff] %v2877_v6  ;;  %873 = vperm.xlu2 %2352, %v2686_v52   ;;  %v2880_v49 = vpop.permute.xlu1 %614  ;;  %v610_v24 = vpop.permute.xlu0 %609  ;;  %v3867_v52 = vmov 2  }
  0xe2   : > { %3897 = vst [vmem:[#allocation29_spill] sm:$0xff] %v2880_v49 }
  0xe8   : > { %922 = vperm.xlu0 %2353, %v2744_v2   ;;  %914 = vperm.xlu1 %2351, %v2715_v59   ;;  %v2884_v41 = vpop.permute.xlu2 %712 }
  0xe9   : > { %3898 = vst [vmem:[#allocation30_spill] sm:$0xff] %v2884_v41  ;;  %918 = vperm.xlu2 %2352, %v2710_v58   ;;  %v2887_v63 = vpop.permute.xlu1 %629  ;;  %v2889_v3 = vpop.permute.xlu0 %624 }
  0xea   : > { %3899 = vst [vmem:[#allocation31_spill] sm:$0xff] %v2887_v63 }
  0xf0   : > { %934 = vperm.xlu0 %2353, %v2768_v9   ;;  %926 = vperm.xlu1 %2351, %v2739_v1   ;;  %v2893_v6 = vpop.permute.xlu2 %727 }
  0xf1   : > { %3900 = vst [vmem:[#allocation32_spill] sm:$0xff] %v2893_v6  ;;  %930 = vperm.xlu2 %2352, %v2734_v0   ;;  %v2896_v49 = vpop.permute.xlu1 %644  ;;  %v2898_v4 = vpop.permute.xlu0 %639 }
  0xf2   : > { %3901 = vst [vmem:[#allocation33_spill] sm:$0xff] %v2896_v49 }
  0xf8   : > { %946 = vperm.xlu0 %2353, %v2792_v15   ;;  %938 = vperm.xlu1 %2351, %v2763_v8   ;;  %v2902_v41 = vpop.permute.xlu2 %742 }
  0xf9   : > { %3902 = vst [vmem:[#allocation34_spill] sm:$0xff] %v2902_v41  ;;  %942 = vperm.xlu2 %2352, %v2758_v7   ;;  %v2905_v63 = vpop.permute.xlu1 %659  ;;  %v2907_v29 = vpop.permute.xlu0 %654 }
  0xfa   : > { %3903 = vst [vmem:[#allocation35_spill] sm:$0xff] %v2905_v63 }
 0x100   : > { %958 = vperm.xlu0 %2353, %v2816_v21   ;;  %950 = vperm.xlu1 %2351, %v2787_v14   ;;  %v2915_v49 = vpop.permute.xlu2 %757 }
 0x101   : > { %3904 = vst [vmem:[#allocation36_spill] sm:$0xff] %v2915_v49  ;;  %954 = vperm.xlu2 %2352, %v2782_v13   ;;  %v2918_v6 = vpop.permute.xlu1 %707  ;;  %v2920_v10 = vpop.permute.xlu0 %702  ;;  %v3864_v49 = vmov 3  }
 0x102   : > { %3905 = vst [vmem:[#allocation37_spill] sm:$0xff] %v2918_v6  ;;  %v2935_v6 = vld [vmem:[%s352_s25] sm:$0xf] }
 0x103   : > { %v2938_v41 = vperm.slane %v2935_v6, 0  ;;  %v2942_v16 = vperm.slane %v2935_v6, 1 }
 0x105   : > { %v669_v55 = vmul.f32 %v2938_v41, %v595_v61  ;;  %v672_v46 = vmul.f32 %v2938_v41, %v610_v24  ;;  %v3909_v24 = vmov 2  }
 0x107   : > { %v685_v26 = vadd.f32 %v669_v55, %v2705_v57 }
 0x108   : > { %970 = vperm.xlu0 %2353, %v2830_v25   ;;  %962 = vperm.xlu1 %2351, %v2811_v20   ;;  %v2928_v63 = vpop.permute.xlu2 %772 }
 0x109   : > { %966 = vperm.xlu2 %2352, %v2806_v19   ;;  %v2931_v33 = vpop.permute.xlu1 %722  ;;  %v2933_v32 = vpop.permute.xlu0 %717 }
 0x10a   : > { %3906 = vst [vmem:[#allocation38_spill] sm:$0xff] %v2931_v33 }
 0x110   : > { %2357 = vset.pattern.permute.xlu0 %v3864_v49  ;;  %2354 = vset.pattern.permute.xlu1 %v3867_v52 }
 0x111   : > { %2355 = vset.pattern.permute.xlu2 %v3867_v52  ;;  %v2947_v33 = vpop.permute.xlu1 %737  ;;  %1356 = vperm.xlu0 %2357, %v2830_v25   ;;  %v2950_v53 = vpop.permute.xlu0 %732 }
 0x112   : > { %3907 = vst [vmem:[#allocation39_spill] sm:$0xff] %v2947_v33  ;;  %1006 = vperm.xlu1 %2354, %v2590_v31   ;;  %1010 = vperm.xlu2 %2355, %v2612_v36   ;;  %v818_v61 = vpop.permute.xlu2 %817  ;;  %v688_v31 = vadd.f32 %v672_v46, %v2617_v37 }
 0x113   : > { %v878_v49 = vmul.f32 %v2942_v16, %v818_v61  ;;  %v3910_v61 = vmov 3  }
 0x115   : > { %v2956_v22 = vadd.f32 %v878_v49, %v685_v26 }
 0x119   : > { %v2959_v52 = vpop.permute.xlu1 %752  ;;  %1324 = vperm.xlu0 %2357, %v2763_v8   ;;  %v2962_v33 = vpop.permute.xlu0 %747 }
 0x11a   : > { %1018 = vperm.xlu1 %2354, %v2602_v34   ;;  %1159 = vperm.xlu2 %2355, %v2806_v19  }
 0x11b   : > { %v830_v36 = vpop.permute.xlu2 %829 }
 0x11c   : > { %v881_v55 = vmul.f32 %v2942_v16, %v830_v36  ;;  %v675_v36 = vmul.f32 %v2938_v41, %v2889_v3  ;;  %v678_v3 = vmul.f32 %v2938_v41, %v2898_v4  ;;  %v681_v4 = vmul.f32 %v2938_v41, %v2907_v29 }
 0x11e   : > { %v2968_v57 = vadd.f32 %v881_v55, %v688_v31 }
 0x120   : > { %3908 = vst [vmem:[#allocation40_spill] sm:$0xff] %v2968_v57 }
 0x121   : > { %v2970_v49 = vpop.permute.xlu1 %767  ;;  %2366 = vset.pattern.permute.xlu0 %v3909_v24  ;;  %v2973_v26 = vpop.permute.xlu0 %762 }
 0x122   : > { %1163 = vperm.xlu1 %2354, %v2830_v25   ;;  %2356 = vset.pattern.permute.xlu2 %v3910_v61 }
 0x123   : > { %1014 = vperm.xlu0 %2366, %v2607_v35   ;;  %1352 = vperm.xlu2 %2356, %v2806_v19   ;;  %v2979_v34 = vpop.permute.xlu2 %837 }
 0x124   : > { %3911 = vst [vmem:[#allocation41_spill] sm:$0xff] %v2979_v34  ;;  %v691_v34 = vadd.f32 %v675_v36, %v2727_v62  ;;  %v694_v62 = vadd.f32 %v678_v3, %v2751_v5 }
 0x129   : > { %v2981_v37 = vpop.permute.xlu0 %777 }
 0x12a   : > { %1151 = vperm.xlu1 %2354, %v2816_v21   ;;  %v2984_v31 = vpop.permute.xlu1 %813 }
 0x12b   : > { %1143 = vperm.xlu0 %2366, %v2787_v14   ;;  %2358 = vset.pattern.permute.xlu2 %v3909_v24  ;;  %v2988_v46 = vpop.permute.xlu2 %849 }
 0x12c   : > { %3912 = vst [vmem:[#allocation42_spill] sm:$0xff] %v2988_v46  ;;  %1155 = vperm.xlu2 %2358, %v2811_v20  }
 0x132   : > { %2359 = vset.pattern.permute.xlu1 %v3910_v61  ;;  %v2992_v35 = vpop.permute.xlu0 %821  ;;  %v2994_v19 = vpop.permute.xlu1 %825 }
 0x133   : > { %1139 = vperm.xlu0 %2366, %v2792_v15   ;;  %1344 = vperm.xlu1 %2359, %v2816_v21   ;;  %v2998_v25 = vpop.permute.xlu2 %861 }
 0x134   : > { %3913 = vst [vmem:[#allocation43_spill] sm:$0xff] %v2998_v25  ;;  %2360 = vset.pattern.permute.xlu2 %v3910_v61 }
 0x135   : > { %1348 = vperm.xlu2 %2360, %v2811_v20  }
 0x13a   : > { %v842_v55 = vpop.permute.xlu0 %841  ;;  %v3004_v46 = vpop.permute.xlu1 %833 }
 0x13b   : > { %3914 = vst [vmem:[#allocation44_spill] sm:$0xff] %v3004_v46  ;;  %1127 = vperm.xlu0 %2366, %v2768_v9   ;;  %v884_v57 = vmul.f32 %v2942_v16, %v842_v55  ;;  %2361 = vset.pattern.permute.xlu1 %v3909_v24  ;;  %v3010_v21 = vpop.permute.xlu2 %873 }
 0x13c   : > { %1147 = vperm.xlu1 %2361, %v2782_v13  }
 0x13d   : > { %v3013_v25 = vadd.f32 %v884_v57, %v691_v34  ;;  %1336 = vperm.xlu2 %2360, %v2787_v14   ;;  %v697_v34 = vadd.f32 %v681_v4, %v2775_v11 }
 0x142   : > { %v854_v20 = vpop.permute.xlu0 %853  ;;  %v3018_v46 = vpop.permute.xlu1 %845 }
 0x143   : > { %1111 = vperm.xlu0 %2366, %v2710_v58   ;;  %v887_v36 = vmul.f32 %v2942_v16, %v854_v20  ;;  %v3023_v55 = vpop.permute.xlu2 %918 }
 0x144   : > { %2362 = vset.pattern.permute.xlu1 %v3910_v61 }
 0x145   : > { %v3026_v57 = vadd.f32 %v887_v36, %v694_v62  ;;  %1340 = vperm.xlu1 %2362, %v2782_v13   ;;  %2363 = vset.pattern.permute.xlu2 %v3909_v24  ;;  %v780_v13 = vmul.f32 %v2920_v10, %v2938_v41 }
 0x146   : > { %1135 = vperm.xlu2 %2363, %v2758_v7  }
 0x147   : > { %v796_v11 = vadd.f32 %v780_v13, %v2799_v17 }
 0x14a   : > { %v866_v5 = vpop.permute.xlu0 %865  ;;  %v3033_v14 = vpop.permute.xlu1 %857 }
 0x14b   : > { %1107 = vperm.xlu0 %2366, %v2715_v59   ;;  %v890_v3 = vmul.f32 %v2942_v16, %v866_v5  ;;  %v3038_v20 = vpop.permute.xlu2 %930 }
 0x14d   : > { %v3040_v62 = vadd.f32 %v890_v3, %v697_v34  ;;  %1328 = vperm.xlu1 %2362, %v2758_v7   ;;  %v783_v7 = vmul.f32 %v2933_v32, %v2938_v41 }
 0x14e   : > { %2364 = vset.pattern.permute.xlu2 %v3910_v61 }
 0x14f   : > { %1332 = vperm.xlu2 %2364, %v2792_v15  }
 0x152   : > { %v911_v29 = vpop.permute.xlu0 %910  ;;  %v3047_v36 = vpop.permute.xlu1 %869 }
 0x153   : > { %3915 = vst [vmem:[#allocation45_spill] sm:$0xff] %v3047_v36  ;;  %1022 = vperm.xlu0 %2366, %v2632_v40   ;;  %v973_v4 = vmul.f32 %v911_v29, %v2942_v16  ;;  %v3052_v5 = vpop.permute.xlu2 %942  ;;  %v799_v40 = vadd.f32 %v783_v7, %v2823_v23  ;;  %v880_v36 = vmul.f32 %v2942_v16, %v2994_v19 }
 0x154   : > { %v794_v19 = vmul.f32 %v2928_v63, %v2938_v41 }
 0x155   : > { %v3054_v34 = vadd.f32 %v973_v4, %v796_v11  ;;  %2365 = vset.pattern.permute.xlu1 %v3909_v24 }
 0x156   : > { %1131 = vperm.xlu1 %2365, %v2763_v8   ;;  %v786_v8 = vmul.f32 %v2950_v53, %v2938_v41  ;;  %v3087_v53 = vperm.slane %v2935_v6, 2 }
 0x157   : > { %1320 = vperm.xlu2 %2364, %v2768_v9  }
 0x15a   : > { %v923_v10 = vpop.permute.xlu0 %922  ;;  %v3061_v15 = vpop.permute.xlu1 %914 }
 0x15b   : > { %1034 = vperm.xlu0 %2366, %v2652_v44   ;;  %v976_v17 = vmul.f32 %v923_v10, %v2942_v16  ;;  %v3066_v3 = vpop.permute.xlu2 %954  ;;  %v802_v44 = vadd.f32 %v786_v8, %v2837_v28 }
 0x15d   : > { %v3068_v13 = vadd.f32 %v976_v17, %v799_v40 }
 0x15e   : > { %1119 = vperm.xlu1 %2365, %v2739_v1  }
 0x15f   : > { %2367 = vset.pattern.permute.xlu2 %v3909_v24 }
 0x160   : > { %1123 = vperm.xlu2 %2367, %v2734_v0  }
 0x162   : > { %v935_v9 = vpop.permute.xlu0 %934  ;;  %v3075_v32 = vpop.permute.xlu1 %926 }
 0x163   : > { %1046 = vperm.xlu0 %2366, %v2672_v48   ;;  %v979_v23 = vmul.f32 %v935_v9, %v2942_v16  ;;  %v967_v29 = vpop.permute.xlu2 %966 }
 0x165   : > { %v3080_v11 = vadd.f32 %v979_v23, %v802_v44  ;;  %v668_v44 = vmul.f32 %v2938_v41, %v2835_v27  ;;  %v877_v23 = vmul.f32 %v2942_v16, %v2984_v31 }
 0x166   : > { %2368 = vset.pattern.permute.xlu1 %v3910_v61 }
 0x167   : > { %1312 = vperm.xlu1 %2368, %v2739_v1  }
 0x168   : > { %2369 = vset.pattern.permute.xlu2 %v3910_v61 }
 0x169   : > { %1316 = vperm.xlu2 %2369, %v2734_v0   ;;  %v1465_v0 = vld [vmem:[%s3855_s6 + $0x70] sm:$0xff] }
 0x16a   : > { %v3089_v4 = vpop.permute.xlu0 %946  ;;  %v3091_v28 = vpop.permute.xlu1 %938 }
 0x16b   : > { %1058 = vperm.xlu0 %2366, %v2696_v54   ;;  %v3917_v54 = vmov 0  }
 0x16c   : > { %v1011_v48 = vpop.permute.xlu2 %1010 }
 0x16d   : > { %v1071_v7 = vmul.f32 %v3087_v53, %v1011_v48  ;;  %v684_v48 = vadd.f32 %v668_v44, %v2681_v51  ;;  %v1460_v51 = vld [vmem:[%s3855_s6 + $0x48] sm:$0xff] }
 0x16f   : > { %v3096_v10 = vadd.f32 %v1071_v7, %v2956_v22  ;;  %2370 = vset.pattern.permute.xlu1 %v3909_v24 }
 0x170   : > { %1115 = vperm.xlu1 %2370, %v2744_v2  }
 0x171   : > { %3916 = vst [vmem:[#allocation46_spill] sm:$0xff] %v3096_v10  ;;  %1304 = vperm.xlu2 %2369, %v2710_v58   ;;  %v1470_v58 = vld [vmem:[%s3855_s6 + $0x98] sm:$0xff] }
 0x172   : > { %v3104_v1 = vpop.permute.xlu0 %958  ;;  %v3106_v40 = vpop.permute.xlu1 %950 }
 0x173   : > { %2376 = vset.pattern.permute.xlu0 %v3917_v54 }
 0x174   : > { %1543 = vperm.xlu0 %2376, %v1465_v0   ;;  %v1160_v17 = vpop.permute.xlu2 %1159 }
 0x175   : > { %v1180_v63 = vmul.f32 %v1160_v17, %v3087_v53 }
 0x178   : > { %2371 = vset.pattern.permute.xlu1 %v3910_v61 }
 0x179   : > { %1308 = vperm.xlu1 %2371, %v2744_v2   ;;  %2372 = vset.pattern.permute.xlu2 %v3909_v24  ;;  %v1467_v2 = vld [vmem:[%s3855_s6 + $0x80] sm:$0xff] }
 0x17a   : > { %1103 = vperm.xlu2 %2372, %v2720_v60   ;;  %v3116_v22 = vpop.permute.xlu1 %962  ;;  %v971_v8 = vpop.permute.xlu0 %970 }
 0x17c   : > { %1568 = vperm.xlu0 %2376, %v1470_v58   ;;  %v893_v58 = vadd.f32 %v877_v23, %v684_v48  ;;  %v795_v48 = vmul.f32 %v2981_v37, %v2938_v41  ;;  %v1455_v37 = vld [vmem:[%s3855_s6 + $0x20] sm:$0xff] }
 0x17d   : > { %v1353_v9 = vpop.permute.xlu2 %1352 }
 0x181   : > { %1296 = vperm.xlu1 %2371, %v2720_v60   ;;  %v671_v60 = vmul.f32 %v2938_v41, %v2843_v30 }
 0x182   : > { %2373 = vset.pattern.permute.xlu2 %v3910_v61 }
 0x183   : > { %1300 = vperm.xlu2 %2373, %v2715_v59   ;;  %v1357_v7 = vpop.permute.xlu0 %1356  ;;  %v687_v59 = vadd.f32 %v671_v60, %v2703_v56  ;;  %v3155_v56 = vperm.slane %v2935_v6, 3  ;;  %v879_v6 = vmul.f32 %v2942_v16, %v2992_v35 }
 0x184   : > { %1553 = vperm.xlu0 %2376, %v1467_v2   ;;  %v1007_v0 = vpop.permute.xlu1 %1006 }
 0x185   : > { %v1070_v27 = vmul.f32 %v3087_v53, %v1007_v0  ;;  %v896_v23 = vadd.f32 %v880_v36, %v687_v59  ;;  %v987_v0 = vmul.f32 %v967_v29, %v2942_v16  ;;  %v988_v36 = vmul.f32 %v971_v8, %v2942_v16 }
 0x186   : > { %v3130_v10 = vpop.permute.xlu2 %1155  ;;  %v811_v29 = vadd.f32 %v795_v48, %v2864_v45  ;;  %v1374_v59 = vmul.f32 %v1357_v7, %v3155_v56 }
 0x187   : > { %v3134_v31 = vadd.f32 %v1070_v27, %v893_v58  ;;  %v810_v27 = vadd.f32 %v794_v19, %v2866_v18 }
 0x189   : > { %2374 = vset.pattern.permute.xlu1 %v3909_v24  ;;  %v1003_v60 = vadd.f32 %v987_v0, %v810_v27 }
 0x18a   : > { %1026 = vperm.xlu1 %2374, %v2627_v39  }
 0x18b   : > { %2375 = vset.pattern.permute.xlu2 %v3909_v24  ;;  %v3145_v44 = vpop.permute.xlu0 %1324  ;;  %v1196_v8 = vadd.f32 %v1180_v63, %v1003_v60  ;;  %v3918_v63 = vld [vmem:[#allocation5_spill] sm:$0xff]  ;;  %v3919_v60 = vld [vmem:[#allocation18_spill] sm:$0xff] }
 0x18c   : > { %1518 = vperm.xlu0 %2376, %v1460_v51   ;;  %v1019_v30 = vpop.permute.xlu1 %1018  ;;  %1030 = vperm.xlu2 %2375, %v2622_v38   ;;  %v670_v38 = vmul.f32 %v2938_v41, %v2873_v12  ;;  %v1373_v12 = vmul.f32 %v1353_v9, %v3155_v56  ;;  %v1004_v51 = vadd.f32 %v988_v36, %v811_v29 }
 0x18d   : > { %v1073_v2 = vmul.f32 %v3087_v53, %v1019_v30  ;;  %v986_v29 = vmul.f32 %v3116_v22, %v2942_v16  ;;  %v3921_v22 = vld [vmem:[#allocation8_spill] sm:$0xff] }
 0x18e   : > { %v686_v18 = vadd.f32 %v670_v38, %v2679_v50  ;;  %v1389_v45 = vadd.f32 %v1373_v12, %v1196_v8  ;;  %v793_v38 = vmul.f32 %v2970_v49, %v2938_v41  ;;  %v1179_v49 = vmul.f32 %v3130_v10, %v3087_v53  ;;  %v3920_v8 = vld [vmem:[#allocation24_spill] sm:$0xff] }
 0x18f   : > { %v3157_v24 = vadd.f32 %v1073_v2, %v896_v23  ;;  %v1349_v58 = vpop.permute.xlu2 %1348 }
 0x190   : > { %v895_v19 = vadd.f32 %v879_v6, %v686_v18  ;;  %v1421_v7 = vmax.f32 %v1389_v45, 0.0  ;;  %v792_v6 = vmul.f32 %v2973_v26, %v2938_v41  ;;  %v809_v12 = vadd.f32 %v793_v38, %v3919_v60  ;;  %v3923_v45 = vld [vmem:[#allocation2_spill] sm:$0xff] }
 0x191   : > { %v985_v18 = vmul.f32 %v3104_v1, %v2942_v16  ;;  %v1372_v26 = vmul.f32 %v1349_v58, %v3155_v56  ;;  %v1466_v58 = vld [vmem:[%s3855_s6 + $0x78] sm:$0xff]  ;;  %v983_v60 = vmul.f32 %v3106_v40, %v2942_v16  ;;  %v1469_v40 = vld [vmem:[%s3855_s6 + $0x90] sm:$0xff] }
 0x192   : > { %1038 = vperm.xlu1 %2374, %v2647_v43  }
 0x194   : > { %1493 = vperm.xlu0 %2376, %v1455_v37   ;;  %v1164_v17 = vpop.permute.xlu1 %1163  ;;  %1042 = vperm.xlu2 %2375, %v2642_v42   ;;  %v1454_v42 = vld [vmem:[%s3855_s6 + $0x18] sm:$0xff] }
 0x195   : > { %v1181_v30 = vmul.f32 %v1164_v17, %v3087_v53  ;;  %v1015_v35 = vpop.permute.xlu0 %1014 }
 0x196   : > { %v1072_v23 = vmul.f32 %v3087_v53, %v1015_v35 }
 0x197   : > { %v1197_v2 = vadd.f32 %v1181_v30, %v1004_v51  ;;  %v3177_v48 = vpop.permute.xlu2 %1336  ;;  %v808_v51 = vadd.f32 %v792_v6, %v3920_v8  ;;  %v3925_v8 = vld [vmem:[#allocation16_spill] sm:$0xff] }
 0x198   : > { %v3179_v9 = vadd.f32 %v1072_v23, %v895_v19  ;;  %v3922_v23 = vld [vmem:[#allocation7_spill] sm:$0xff] }
 0x199   : > { %v1390_v50 = vadd.f32 %v1374_v59, %v1197_v2  ;;  %v1002_v59 = vadd.f32 %v986_v29, %v809_v12  ;;  %v1001_v35 = vadd.f32 %v985_v18, %v808_v51  ;;  %v3924_v18 = vld [vmem:[#allocation36_spill] sm:$0xff] }
 0x19a   : > { %1050 = vperm.xlu1 %2374, %v2667_v47  }
 0x19b   : > { %v1422_v0 = vmax.f32 %v1390_v50, 0.0  ;;  %v1195_v19 = vadd.f32 %v1179_v49, %v1002_v59  ;;  %v791_v49 = vmul.f32 %v3924_v18, %v2938_v41  ;;  %v1464_v59 = vld [vmem:[%s3855_s6 + $0x68] sm:$0xff]  ;;  %v3929_v18 = vld [vmem:[#allocation22_spill] sm:$0xff] }
 0x19c   : > { %1488 = vperm.xlu0 %2376, %v1454_v42   ;;  %v1152_v27 = vpop.permute.xlu1 %1151  ;;  %1054 = vperm.xlu2 %2375, %v3918_v63   ;;  %v1463_v63 = vld [vmem:[%s3855_s6 + $0x60] sm:$0xff] }
 0x19d   : > { %v1144_v36 = vpop.permute.xlu0 %1143  ;;  %v1450_v37 = vpack.c.bf16 %v1422_v0, %v1421_v7  ;;  %v1178_v30 = vmul.f32 %v1152_v27, %v3087_v53  ;;  %v1388_v2 = vadd.f32 %v1372_v26, %v1195_v19 }
 0x19f   : > { %1631 = vmatpush.bf16.msra.mxu0 %v1450_v37  ;;  %2304 = vmatpush.bf16.msra.mxu3 %v1450_v37  ;;  %v1194_v42 = vadd.f32 %v1178_v30, %v1001_v35  ;;  %v1420_v38 = vmax.f32 %v1388_v2, 0.0  ;;  %v790_v37 = vmul.f32 %v2959_v52, %v2938_v41  ;;  %v1176_v52 = vmul.f32 %v1144_v36, %v3087_v53  ;;  %v3926_v35 = vld [vmem:[#allocation25_spill] sm:$0xff] }
 0x1a0   : > { %v3197_v17 = vpop.permute.xlu2 %1135  ;;  %v807_v19 = vadd.f32 %v791_v49, %v3926_v35 }
 0x1a1   : > { %v806_v51 = vadd.f32 %v790_v37, %v3925_v8 }
 0x1a2   : > { %1062 = vperm.xlu1 %2374, %v3921_v22  }
 0x1a3   : > { %v999_v30 = vadd.f32 %v983_v60, %v806_v51  ;;  %v1174_v51 = vmul.f32 %v3197_v17, %v3087_v53  ;;  %v1468_v17 = vld [vmem:[%s3855_s6 + $0x88] sm:$0xff] }
 0x1a4   : > { %2379 = vset.pattern.permute.xlu0 %v3910_v61  ;;  %1066 = vperm.xlu2 %2375, %v3922_v23   ;;  %v1369_v23 = vmul.f32 %v3177_v48, %v3155_v56 }
 0x1a5   : > { %v1140_v1 = vpop.permute.xlu0 %1139  ;;  %1199 = vperm.xlu0 %2379, %v3923_v45   ;;  %v1345_v10 = vpop.permute.xlu1 %1344  ;;  %v1192_v36 = vadd.f32 %v1176_v52, %v999_v30 }
 0x1a6   : > { %v1371_v50 = vmul.f32 %v1345_v10, %v3155_v56  ;;  %v789_v10 = vmul.f32 %v2962_v33, %v2938_v41  ;;  %v1461_v33 = vld [vmem:[%s3855_s6 + $0x50] sm:$0xff] }
 0x1a8   : > { %v1387_v7 = vadd.f32 %v1371_v50, %v1194_v42  ;;  %v3927_v42 = vld [vmem:[#allocation34_spill] sm:$0xff] }
 0x1a9   : > { %v1333_v0 = vpop.permute.xlu2 %1332  ;;  %v788_v50 = vmul.f32 %v3927_v42, %v2938_v41 }
 0x1aa   : > { %v1419_v27 = vmax.f32 %v1387_v7, 0.0  ;;  %2377 = vset.pattern.permute.xlu1 %v3917_v54  ;;  %v982_v7 = vmul.f32 %v3089_v4, %v2942_v16  ;;  %v1462_v4 = vld [vmem:[%s3855_s6 + $0x58] sm:$0xff]  ;;  %v1368_v52 = vmul.f32 %v1333_v0, %v3155_v56 }
 0x1ab   : > { %1548 = vperm.xlu1 %2377, %v1466_v58   ;;  %v804_v49 = vadd.f32 %v788_v50, %v3929_v18  ;;  %v1458_v18 = vld [vmem:[%s3855_s6 + $0x38] sm:$0xff] }
 0x1ac   : > { %2378 = vset.pattern.permute.xlu2 %v3917_v54  ;;  %v1449_v6 = vpack.c.bf16 %v1420_v38, %v1419_v27  ;;  %v1385_v27 = vadd.f32 %v1369_v23, %v1192_v36 }
 0x1ad   : > { %v3217_v29 = vpop.permute.xlu0 %1127  ;;  %1219 = vperm.xlu0 %2379, %v2627_v39   ;;  %1533 = vperm.xlu2 %2378, %v1463_v63   ;;  %v984_v39 = vmul.f32 %v3066_v3, %v2942_v16  ;;  %v3928_v63 = vld [vmem:[#allocation21_spill] sm:$0xff] }
 0x1ae   : > { %v1148_v12 = vpop.permute.xlu1 %1147  ;;  %1632 = vmatpush.bf16.msra.mxu0 %v1449_v6  ;;  %2305 = vmatpush.bf16.msra.mxu3 %v1449_v6  ;;  %v805_v37 = vadd.f32 %v789_v10, %v3928_v63  ;;  %v1175_v6 = vmul.f32 %v1140_v1, %v3087_v53 }
 0x1af   : > { %v1177_v45 = vmul.f32 %v1148_v12, %v3087_v53  ;;  %v1000_v3 = vadd.f32 %v984_v39, %v807_v19 }
 0x1b0   : > { %v998_v8 = vadd.f32 %v982_v7, %v805_v37  ;;  %v980_v7 = vmul.f32 %v3091_v28, %v2942_v16  ;;  %v1457_v28 = vld [vmem:[%s3855_s6 + $0x30] sm:$0xff] }
 0x1b1   : > { %v1321_v26 = vpop.permute.xlu2 %1320  ;;  %v1193_v48 = vadd.f32 %v1177_v45, %v1000_v3  ;;  %v3930_v45 = vld [vmem:[#allocation39_spill] sm:$0xff] }
 0x1b2   : > { %v1191_v30 = vadd.f32 %v1175_v6, %v998_v8  ;;  %v787_v10 = vmul.f32 %v3930_v45, %v2938_v41  ;;  %v1365_v37 = vmul.f32 %v1321_v26, %v3155_v56  ;;  %v1366_v26 = vmul.f32 %v3145_v44, %v3155_v56 }
 0x1b3   : > { %1538 = vperm.xlu1 %2377, %v1464_v59  }
 0x1b4   : > { %v1384_v23 = vadd.f32 %v1368_v52, %v1191_v30  ;;  %v3933_v30 = vld [vmem:[#allocation32_spill] sm:$0xff] }
 0x1b5   : > { %v3240_v2 = vpop.permute.xlu0 %1111  ;;  %1231 = vperm.xlu0 %2379, %v2647_v43   ;;  %1563 = vperm.xlu2 %2378, %v1469_v40   ;;  %v981_v43 = vmul.f32 %v3052_v5, %v2942_v16  ;;  %v1417_v5 = vmax.f32 %v1385_v27, 0.0  ;;  %v3931_v27 = vld [vmem:[#allocation14_spill] sm:$0xff] }
 0x1b6   : > { %v1416_v42 = vmax.f32 %v1384_v23, 0.0  ;;  %v803_v63 = vadd.f32 %v787_v10, %v3931_v27  ;;  %v3934_v23 = vld [vmem:[#allocation38_spill] sm:$0xff]  ;;  %v977_v10 = vmul.f32 %v3075_v32, %v2942_v16 }
 0x1b7   : > { %v1341_v58 = vpop.permute.xlu1 %1340  ;;  %v997_v1 = vadd.f32 %v981_v43, %v804_v49  ;;  %v3932_v43 = vld [vmem:[#allocation40_spill] sm:$0xff] }
 0x1b8   : > { %v1370_v38 = vmul.f32 %v1341_v58, %v3155_v56  ;;  %v1172_v58 = vmul.f32 %v3217_v29, %v3087_v53  ;;  %v996_v29 = vadd.f32 %v980_v7, %v803_v63  ;;  %v3936_v7 = vld [vmem:[#allocation12_spill] sm:$0xff] }
 0x1b9   : > { %v1190_v19 = vadd.f32 %v1174_v51, %v997_v1 }
 0x1ba   : > { %v1386_v60 = vadd.f32 %v1370_v38, %v1193_v48  ;;  %v3255_v12 = vpop.permute.xlu2 %1123 }
 0x1bb   : > { %1523 = vperm.xlu1 %2377, %v1461_v33  }
 0x1bc   : > { %v1418_v59 = vmax.f32 %v1386_v60, 0.0 }
 0x1bd   : > { %v3264_v39 = vpop.permute.xlu0 %1107  ;;  %1243 = vperm.xlu0 %2379, %v2667_v47   ;;  %1528 = vperm.xlu2 %2378, %v1462_v4   ;;  %v1459_v47 = vld [vmem:[%s3855_s6 + $0x40] sm:$0xff] }
 0x1be   : > { %v1448_v40 = vpack.c.bf16 %v1418_v59, %v1417_v5 }
 0x1bf   : > { %v1329_v35 = vpop.permute.xlu1 %1328 }
 0x1c0   : > { %v1367_v36 = vmul.f32 %v1329_v35, %v3155_v56  ;;  %1633 = vmatpush.bf16.msra.mxu0 %v1448_v40  ;;  %2306 = vmatpush.bf16.msra.mxu3 %v1448_v40  ;;  %v785_v40 = vmul.f32 %v3933_v30, %v2938_v41 }
 0x1c2   : > { %v1383_v0 = vadd.f32 %v1367_v36, %v1190_v19  ;;  %v1456_v19 = vld [vmem:[%s3855_s6 + $0x28] sm:$0xff]  ;;  %v784_v36 = vmul.f32 %v3934_v23, %v2938_v41 }
 0x1c3   : > { %1558 = vperm.xlu1 %2377, %v1468_v17   ;;  %v1317_v3 = vpop.permute.xlu2 %1316  ;;  %v3940_v23 = vld [vmem:[#allocation11_spill] sm:$0xff] }
 0x1c4   : > { %v1415_v50 = vmax.f32 %v1383_v0, 0.0  ;;  %v978_v0 = vmul.f32 %v3038_v20, %v2942_v16 }
 0x1c5   : > { %v1023_v48 = vpop.permute.xlu0 %1022  ;;  %1255 = vperm.xlu0 %2379, %v3921_v22   ;;  %1513 = vperm.xlu2 %2378, %v1459_v47   ;;  %v1188_v22 = vadd.f32 %v1172_v58, %v3080_v11  ;;  %v1453_v47 = vld [vmem:[%s3855_s6 + $0x10] sm:$0xff]  ;;  %v800_v58 = vadd.f32 %v784_v36, %v3936_v7 }
 0x1c6   : > { %v1074_v38 = vmul.f32 %v3087_v53, %v1023_v48  ;;  %v1447_v33 = vpack.c.bf16 %v1416_v42, %v1415_v50  ;;  %v1171_v42 = vmul.f32 %v3255_v12, %v3087_v53  ;;  %v1451_v12 = vld [vmem:[%s3855_s6] sm:$0xff] }
 0x1c7   : > { %v1381_v49 = vadd.f32 %v1365_v37, %v1188_v22  ;;  %v993_v63 = vadd.f32 %v977_v10, %v800_v58 }
 0x1c8   : > { %v3285_v6 = vadd.f32 %v1074_v38, %v3932_v43  ;;  %v1132_v60 = vpop.permute.xlu1 %1131  ;;  %1634 = vmatpush.bf16.msra.mxu0 %v1447_v33  ;;  %2307 = vmatpush.bf16.msra.mxu3 %v1447_v33  ;;  %v1364_v38 = vmul.f32 %v1317_v3, %v3155_v56  ;;  %v1452_v3 = vld [vmem:[%s3855_s6 + $0x8] sm:$0xff] }
 0x1c9   : > { %v1173_v4 = vmul.f32 %v1132_v60, %v3087_v53  ;;  %v1413_v5 = vmax.f32 %v1381_v49, 0.0 }
 0x1cb   : > { %v1189_v8 = vadd.f32 %v1173_v4, %v996_v29  ;;  %1503 = vperm.xlu1 %2377, %v1457_v28   ;;  %v3297_v51 = vpop.permute.xlu2 %1304 }
 0x1cd   : > { %v1035_v52 = vpop.permute.xlu0 %1034  ;;  %1508 = vperm.xlu2 %2378, %v1458_v18   ;;  %v1382_v59 = vadd.f32 %v1366_v26, %v1189_v8  ;;  %2383 = vset.pattern.permute.xlu0 %v3917_v54 }
 0x1ce   : > { %v1077_v11 = vmul.f32 %v3087_v53, %v1035_v52 }
 0x1cf   : > { %v1414_v1 = vmax.f32 %v1382_v59, 0.0  ;;  %v3937_v59 = vld [vmem:[#allocation23_spill] sm:$0xff] }
 0x1d0   : > { %v3304_v35 = vadd.f32 %v1077_v11, %v3013_v25  ;;  %v1120_v44 = vpop.permute.xlu1 %1119  ;;  %v3935_v25 = vld [vmem:[#allocation20_spill] sm:$0xff]  ;;  %v674_v11 = vmul.f32 %v2938_v41, %v3937_v59 }
 0x1d1   : > { %v1446_v17 = vpack.c.bf16 %v1414_v1, %v1413_v5  ;;  %v801_v45 = vadd.f32 %v785_v40, %v3935_v25  ;;  %v1170_v33 = vmul.f32 %v1120_v44, %v3087_v53  ;;  %v3938_v5 = vld [vmem:[#allocation30_spill] sm:$0xff]  ;;  %v3939_v40 = vld [vmem:[#allocation41_spill] sm:$0xff]  ;;  %v2386_v25 = vld [vmem:[%s3850_s1 + $0x10] sm:$0xff] }
 0x1d2   : > { %v782_v1 = vmul.f32 %v3938_v5, %v2938_v41  ;;  %v883_v44 = vmul.f32 %v2942_v16, %v3939_v40  ;;  %v690_v36 = vadd.f32 %v674_v11, %v3940_v23 }
 0x1d3   : > { %1498 = vperm.xlu1 %2377, %v1456_v19   ;;  %1635 = vmatpush.bf16.msra.mxu0 %v1446_v17  ;;  %v994_v48 = vadd.f32 %v978_v0, %v801_v45  ;;  %v1186_v28 = vadd.f32 %v1170_v33, %v993_v63  ;;  %v975_v19 = vmul.f32 %v3023_v55, %v2942_v16  ;;  %v3944_v63 = vld [vmem:[#allocation42_spill] sm:$0xff] }
 0x1d4   : > { %2308 = vmatpush.bf16.msra.mxu3 %v1446_v17  ;;  %v3321_v50 = vpop.permute.xlu2 %1103  ;;  %v3941_v17 = vld [vmem:[#allocation19_spill] sm:$0xff]  ;;  %v899_v10 = vadd.f32 %v883_v44, %v690_v36 }
 0x1d5   : > { %v1047_v20 = vpop.permute.xlu0 %1046  ;;  %1483 = vperm.xlu2 %2378, %v1453_v47   ;;  %v1187_v37 = vadd.f32 %v1171_v42, %v994_v48  ;;  %v798_v0 = vadd.f32 %v782_v1, %v3941_v17  ;;  %v1168_v47 = vmul.f32 %v3240_v2, %v3087_v53  ;;  %v3943_v48 = vld [vmem:[#allocation37_spill] sm:$0xff]  ;;  %v3947_v44 = vld [vmem:[#allocation27_spill] sm:$0xff] }
 0x1d6   : > { %v1080_v27 = vmul.f32 %v3087_v53, %v1047_v20  ;;  %v3942_v20 = vld [vmem:[#allocation26_spill] sm:$0xff]  ;;  %v3948_v17 = vld [vmem:[#allocation43_spill] sm:$0xff] }
 0x1d7   : > { %v1380_v60 = vadd.f32 %v1364_v38, %v1187_v37  ;;  %v991_v7 = vadd.f32 %v975_v19, %v798_v0  ;;  %v677_v2 = vmul.f32 %v2938_v41, %v3942_v20  ;;  %v781_v38 = vmul.f32 %v3943_v48, %v2938_v41  ;;  %v3950_v20 = vld [vmem:[#allocation29_spill] sm:$0xff] }
 0x1d8   : > { %v3328_v32 = vadd.f32 %v1080_v27, %v3026_v57  ;;  %v886_v37 = vmul.f32 %v2942_v16, %v3944_v63  ;;  %v680_v19 = vmul.f32 %v2938_v41, %v3947_v44  ;;  %v889_v0 = vmul.f32 %v2942_v16, %v3948_v17  ;;  %v3956_v17 = vld [vmem:[#allocation4_spill] sm:$0xff] }
 0x1d9   : > { %v1313_v43 = vpop.permute.xlu1 %1312  ;;  %v1412_v57 = vmax.f32 %v1380_v60, 0.0  ;;  %v1184_v27 = vadd.f32 %v1168_v47, %v991_v7 }
 0x1da   : > { %v1363_v29 = vmul.f32 %v1313_v43, %v3155_v56 }
 0x1db   : > { %1473 = vperm.xlu1 %2377, %v1451_v12   ;;  %v974_v12 = vmul.f32 %v3061_v15, %v2942_v16  ;;  %v2388_v15 = vld [vmem:[%s3850_s1 + $0x20] sm:$0xff] }
 0x1dc   : > { %v1379_v22 = vadd.f32 %v1363_v29, %v1186_v28  ;;  %v2387_v29 = vld [vmem:[%s3850_s1 + $0x18] sm:$0xff] }
 0x1dd   : > { %v1059_v4 = vpop.permute.xlu0 %1058  ;;  %1478 = vperm.xlu2 %2378, %v1452_v3   ;;  %v1301_v18 = vpop.permute.xlu2 %1300  ;;  %v3945_v3 = vld [vmem:[#allocation13_spill] sm:$0xff] }
 0x1de   : > { %v1411_v26 = vmax.f32 %v1379_v22, 0.0  ;;  %v1083_v49 = vmul.f32 %v3087_v53, %v1059_v4  ;;  %v693_v22 = vadd.f32 %v677_v2, %v3945_v3  ;;  %v3946_v4 = vld [vmem:[#allocation10_spill] sm:$0xff]  ;;  %v1360_v40 = vmul.f32 %v1301_v18, %v3155_v56  ;;  %v3949_v18 = vld [vmem:[#allocation15_spill] sm:$0xff] }
 0x1df   : > { %v673_v2 = vmul.f32 %v2938_v41, %v3950_v20  ;;  %v3958_v20 = vld [vmem:[#allocation6_spill] sm:$0xff] }
 0x1e0   : > { %v3339_v8 = vadd.f32 %v1083_v49, %v3040_v62  ;;  %v1445_v52 = vpack.c.bf16 %v1412_v57, %v1411_v26  ;;  %v2385_v62 = vld [vmem:[%s3850_s1 + $0x8] sm:$0xff]  ;;  %v797_v57 = vadd.f32 %v781_v38, %v3946_v4  ;;  %v1167_v26 = vmul.f32 %v3264_v39, %v3087_v53  ;;  %v2278_v4 = vld [vmem:[%s3854_s5] sm:$0xff] }
 0x1e1   : > { %v902_v59 = vadd.f32 %v886_v37, %v693_v22  ;;  %v3951_v37 = vld [vmem:[#allocation28_spill] sm:$0xff]  ;;  %v892_v22 = vmul.f32 %v2942_v16, %v3010_v21 }
 0x1e2   : > { %v1116_v30 = vpop.permute.xlu1 %1115  ;;  %1636 = vmatpush.bf16.msra.mxu0 %v1445_v52  ;;  %2309 = vmatpush.bf16.msra.mxu3 %v1445_v52  ;;  %v990_v11 = vadd.f32 %v974_v12, %v797_v57  ;;  %v683_v12 = vmul.f32 %v2938_v41, %v3951_v37  ;;  %v2391_v57 = vld [vmem:[%s3850_s1 + $0x48] sm:$0xff] }
 0x1e3   : > { %2380 = vset.pattern.permute.xlu1 %v3910_v61  ;;  %v1169_v58 = vmul.f32 %v1116_v30, %v3087_v53  ;;  %v1166_v30 = vmul.f32 %v3321_v50, %v3087_v53  ;;  %v2389_v50 = vld [vmem:[%s3850_s1 + $0x30] sm:$0xff] }
 0x1e4   : > { %1203 = vperm.xlu1 %2380, %v2385_v62   ;;  %v1183_v23 = vadd.f32 %v1167_v26, %v990_v11  ;;  %v2392_v11 = vld [vmem:[%s3850_s1 + $0x50] sm:$0xff] }
 0x1e5   : > { %2381 = vset.pattern.permute.xlu2 %v3910_v61  ;;  %v1361_v61 = vmul.f32 %v3297_v51, %v3155_v56  ;;  %v1185_v51 = vadd.f32 %v1169_v58, %v3068_v13 }
 0x1e6   : > { %1207 = vperm.xlu2 %2381, %v2386_v25   ;;  %v1031_v55 = vpop.permute.xlu2 %1030  ;;  %v3361_v45 = vpop.permute.xlu0 %1543  ;;  %v1182_v25 = vadd.f32 %v1166_v30, %v3054_v34  ;;  %v3955_v30 = vld [vmem:[#allocation31_spill] sm:$0xff] }
 0x1e7   : > { %v1076_v42 = vmul.f32 %v3087_v53, %v1031_v55  ;;  %v1377_v60 = vadd.f32 %v1361_v61, %v1184_v27  ;;  %v1376_v55 = vadd.f32 %v1360_v40, %v1183_v23  ;;  %v2390_v61 = vld [vmem:[%s3850_s1 + $0x38] sm:$0xff]  ;;  %v676_v40 = vmul.f32 %v2938_v41, %v3955_v30 }
 0x1e8   : > { %v885_v23 = vmul.f32 %v2942_v16, %v3018_v46  ;;  %v3957_v46 = vld [vmem:[#allocation33_spill] sm:$0xff] }
 0x1e9   : > { %v3371_v33 = vadd.f32 %v1076_v42, %v899_v10  ;;  %v1409_v1 = vmax.f32 %v1377_v60, 0.0  ;;  %v696_v42 = vadd.f32 %v680_v19, %v3949_v18  ;;  %v1408_v27 = vmax.f32 %v1376_v55, 0.0 }
 0x1eb   : > { %v1309_v43 = vpop.permute.xlu1 %1308  ;;  %v905_v48 = vadd.f32 %v889_v0, %v696_v42  ;;  %v692_v0 = vadd.f32 %v676_v40, %v3956_v17  ;;  %v679_v42 = vmul.f32 %v2938_v41, %v3957_v46 }
 0x1ec   : > { %v1362_v28 = vmul.f32 %v1309_v43, %v3155_v56  ;;  %1211 = vperm.xlu1 %2380, %v2387_v29   ;;  %v3952_v43 = vld [vmem:[#allocation44_spill] sm:$0xff]  ;;  %v3953_v29 = vld [vmem:[#allocation3_spill] sm:$0xff] }
 0x1ed   : > { %v882_v60 = vmul.f32 %v2942_v16, %v3952_v43  ;;  %v689_v3 = vadd.f32 %v673_v2, %v3953_v29  ;;  %v901_v55 = vadd.f32 %v885_v23, %v692_v0  ;;  %v695_v2 = vadd.f32 %v679_v42, %v3958_v20  ;;  %v3959_v43 = vld [vmem:[#allocation35_spill] sm:$0xff]  ;;  %v2281_v0 = vld [vmem:[%s3854_s5 + $0x18] sm:$0xff]  ;;  %v2282_v42 = vld [vmem:[%s3854_s5 + $0x20] sm:$0xff] }
 0x1ee   : > { %v1378_v49 = vadd.f32 %v1362_v28, %v1185_v51  ;;  %1215 = vperm.xlu2 %2381, %v2388_v15   ;;  %v1043_v13 = vpop.permute.xlu2 %1042  ;;  %v3389_v52 = vpop.permute.xlu0 %1568  ;;  %v3954_v15 = vld [vmem:[#allocation17_spill] sm:$0xff] }
 0x1ef   : > { %v1079_v5 = vmul.f32 %v3087_v53, %v1043_v13  ;;  %v699_v13 = vadd.f32 %v683_v12, %v3954_v15 }
 0x1f0   : > { %v1410_v39 = vmax.f32 %v1378_v49, 0.0  ;;  %v2285_v49 = vld [vmem:[%s3854_s5 + $0x38] sm:$0xff] }
 0x1f1   : > { %v3397_v62 = vadd.f32 %v1079_v5, %v902_v59  ;;  %v898_v59 = vadd.f32 %v882_v60, %v689_v3  ;;  %v682_v60 = vmul.f32 %v2938_v41, %v3959_v43  ;;  %v3960_v3 = vld [vmem:[#allocation45_spill] sm:$0xff] }
 0x1f2   : > { %v1444_v36 = vpack.c.bf16 %v1410_v39, %v1409_v1  ;;  %v908_v39 = vadd.f32 %v892_v22, %v699_v13  ;;  %v891_v22 = vmul.f32 %v2942_v16, %v3960_v3 }
 0x1f3   : > { %v1297_v47 = vpop.permute.xlu1 %1296 }
 0x1f4   : > { %v1359_v10 = vmul.f32 %v1297_v47, %v3155_v56  ;;  %1223 = vperm.xlu1 %2380, %v2389_v50   ;;  %1637 = vmatpush.bf16.msra.mxu0 %v1444_v36  ;;  %v2393_v47 = vld [vmem:[%s3850_s1 + $0x60] sm:$0xff]  ;;  %v2394_v50 = vld [vmem:[%s3850_s1 + $0x68] sm:$0xff] }
 0x1f5   : > { %2310 = vmatpush.bf16.msra.mxu3 %v1444_v36 }
 0x1f6   : > { %v1375_v7 = vadd.f32 %v1359_v10, %v1182_v25  ;;  %1227 = vperm.xlu2 %2381, %v2390_v61   ;;  %v1055_v58 = vpop.permute.xlu2 %1054  ;;  %v3410_v34 = vpop.permute.xlu0 %1553 }
 0x1f7   : > { %v1082_v38 = vmul.f32 %v3087_v53, %v1055_v58  ;;  %v888_v58 = vmul.f32 %v2942_v16, %v3033_v14  ;;  %v2287_v16 = vld [vmem:[%s3854_s5 + $0x48] sm:$0xff] }
 0x1f8   : > { %v1407_v63 = vmax.f32 %v1375_v7, 0.0 }
 0x1f9   : > { %v3419_v51 = vadd.f32 %v1082_v38, %v905_v48  ;;  %v2279_v48 = vld [vmem:[%s3854_s5 + $0x8] sm:$0xff]  ;;  %v2395_v38 = vld [vmem:[%s3850_s1 + $0x78] sm:$0xff]  ;;  %v904_v37 = vadd.f32 %v888_v58, %v695_v2 }
 0x1fa   : > { %v1443_v28 = vpack.c.bf16 %v1408_v27, %v1407_v63  ;;  %v2286_v63 = vld [vmem:[%s3854_s5 + $0x40] sm:$0xff] }
 0x1fc   : > { %1235 = vperm.xlu1 %2380, %v2391_v57   ;;  %v1027_v26 = vpop.permute.xlu1 %1026  ;;  %1638 = vmatpush.bf16.msra.mxu0 %v1443_v28 }
 0x1fd   : > { %v1075_v21 = vmul.f32 %v3087_v53, %v1027_v26  ;;  %2311 = vmatpush.bf16.msra.mxu3 %v1443_v28 }
 0x1fe   : > { %1239 = vperm.xlu2 %2381, %v2392_v11   ;;  %v1067_v5 = vpop.permute.xlu2 %1066  ;;  %v3438_v1 = vpop.permute.xlu0 %1518 }
 0x1ff   : > { %v1091_v44 = vadd.f32 %v1075_v21, %v898_v59  ;;  %v1085_v19 = vmul.f32 %v3087_v53, %v1067_v5  ;;  %1639 = vmatmul.bf16.vlgmr.msra.gmra.mxu0 %v2278_v4  ;;  %v3961_v4 = vld [vmem:[#allocation9_spill] sm:$0xff]  ;;  %v2280_v21 = vld [vmem:[%s3854_s5 + $0x10] sm:$0xff] }
 0x200   : > { %1674 = vmatmul.bf16.vlgmr.msra.gmra.mxu3 %v2285_v49  ;;  %v698_v57 = vadd.f32 %v682_v60, %v3961_v4 }
 0x201   : > { %v3445_v36 = vadd.f32 %v1085_v19, %v908_v39 }
 0x202   : > { %v907_v49 = vadd.f32 %v891_v22, %v698_v57  ;;  %v2284_v22 = vld [vmem:[%s3854_s5 + $0x30] sm:$0xff] }
 0x204   : > { %1247 = vperm.xlu1 %2380, %v2393_v47   ;;  %v1039_v25 = vpop.permute.xlu1 %1038 }
 0x205   : > { %v1078_v10 = vmul.f32 %v3087_v53, %v1039_v25 }
 0x206   : > { %1251 = vperm.xlu2 %2381, %v2394_v50   ;;  %v3455_v18 = vpop.permute.xlu0 %1493 }
 0x207   : > { %v1094_v7 = vadd.f32 %v1078_v10, %v901_v55  ;;  %v3459_v61 = vpop.permute.xlu2 %1533 }
 0x20c   : > { %1259 = vperm.xlu1 %2380, %v2395_v38   ;;  %v1051_v27 = vpop.permute.xlu1 %1050 }
 0x20d   : > { %v1081_v12 = vmul.f32 %v3087_v53, %v1051_v27  ;;  %v2283_v27 = vld [vmem:[%s3854_s5 + $0x28] sm:$0xff] }
 0x20e   : > { %v3474_v14 = vpop.permute.xlu0 %1488  ;;  %2382 = vset.pattern.permute.xlu2 %v3917_v54 }
 0x20f   : > { %v1097_v28 = vadd.f32 %v1081_v12, %v904_v37  ;;  %1644 = vmatmul.bf16.gmra.mxu0 %v2279_v48  ;;  %v3479_v29 = vpop.permute.xlu2 %1563 }
 0x210   : > { %1679 = vmatmul.bf16.gmra.mxu3 %v2286_v63 }
 0x214   : > { %v1063_v26 = vpop.permute.xlu1 %1062  ;;  %2384 = vset.pattern.permute.xlu1 %v3917_v54 }
 0x215   : > { %v1084_v15 = vmul.f32 %v3087_v53, %v1063_v26 }
 0x217   : > { %v3486_v13 = vadd.f32 %v1084_v15, %v907_v49  ;;  %v3488_v59 = vpop.permute.xlu0 %1199  ;;  %v3490_v41 = vpop.permute.xlu2 %1528 }
 0x21d   : > { %v3498_v11 = vpop.permute.xlu1 %1548 }
 0x21f   : > { %v1220_v54 = vpop.permute.xlu0 %1219  ;;  %1649 = vmatmul.bf16.gmra.mxu0 %v2280_v21  ;;  %v3500_v5 = vpop.permute.xlu2 %1513 }
 0x220   : > { %v1268_v53 = vmul.f32 %v3155_v56, %v1220_v54  ;;  %1684 = vmatmul.bf16.gmra.mxu3 %v2287_v16 }
 0x222   : > { %v3503_v30 = vadd.f32 %v1268_v53, %v1091_v44 }
 0x225   : > { %v3505_v40 = vpop.permute.xlu1 %1538 }
 0x227   : > { %v1232_v39 = vpop.permute.xlu0 %1231  ;;  %v3507_v19 = vpop.permute.xlu2 %1508 }
 0x228   : > { %v1271_v23 = vmul.f32 %v3155_v56, %v1232_v39 }
 0x22a   : > { %v3510_v17 = vadd.f32 %v1271_v23, %v1094_v7 }
 0x22d   : > { %v3515_v47 = vpop.permute.xlu1 %1523 }
 0x22f   : > { %v1244_v25 = vpop.permute.xlu0 %1243  ;;  %1654 = vmatmul.bf16.gmra.mxu0 %v2281_v0  ;;  %v1484_v55 = vpop.permute.xlu2 %1483 }
 0x230   : > { %v1274_v44 = vmul.f32 %v3155_v56, %v1244_v25 }
 0x232   : > { %v3518_v10 = vadd.f32 %v1274_v44, %v1097_v28 }
 0x235   : > { %v3520_v50 = vpop.permute.xlu1 %1558 }
 0x237   : > { %v1479_v46 = vpop.permute.xlu2 %1478 }
 0x23d   : > { %v3525_v7 = vpop.permute.xlu1 %1503 }
 0x23f   : > { %1659 = vmatmul.bf16.gmra.mxu0 %v2282_v42 }
 0x240   : > { %v3527_v58 = vpop.permute.xlu2 %1207 }
 0x245   : > { %v1499_v20 = vpop.permute.xlu1 %1498 }
 0x248   : > { %v1216_v2 = vpop.permute.xlu2 %1215 }
 0x249   : > { %v1267_v48 = vmul.f32 %v3155_v56, %v1216_v2 }
 0x24b   : > { %v3531_v38 = vadd.f32 %v1267_v48, %v3285_v6 }
 0x24d   : > { %v1474_v63 = vpop.permute.xlu1 %1473 }
 0x24f   : > { %1664 = vmatmul.bf16.gmra.mxu0 %v2283_v27 }
 0x250   : > { %v1228_v37 = vpop.permute.xlu2 %1227 }
 0x251   : > { %v1270_v12 = vmul.f32 %v3155_v56, %v1228_v37 }
 0x253   : > { %v3538_v43 = vadd.f32 %v1270_v12, %v3304_v35 }
 0x256   : > { %v3540_v60 = vpop.permute.xlu1 %1203 }
 0x258   : > { %v1240_v28 = vpop.permute.xlu2 %1239 }
 0x259   : > { %v1273_v3 = vmul.f32 %v3155_v56, %v1240_v28 }
 0x25b   : > { %v3544_v6 = vadd.f32 %v1273_v3, %v3328_v32 }
 0x25e   : > { %v3549_v4 = vpop.permute.xlu1 %1211 }
 0x25f   : > { %1669 = vmatmul.bf16.gmra.mxu0 %v2284_v22 }
 0x266   : > { %v1224_v57 = vpop.permute.xlu1 %1223 }
 0x267   : > { %v1269_v26 = vmul.f32 %v3155_v56, %v1224_v57 }
 0x269   : > { %v3553_v35 = vadd.f32 %v1269_v26, %v3371_v33 }
 0x26e   : > { %v1236_v49 = vpop.permute.xlu1 %1235 }
 0x26f   : > { %v1272_v15 = vmul.f32 %v3155_v56, %v1236_v49 }
 0x271   : > { %v3557_v21 = vadd.f32 %v1272_v15, %v3397_v62 }
 0x276   : > { %v1248_v32 = vpop.permute.xlu1 %1247 }
 0x277   : > { %v1275_v16 = vmul.f32 %v3155_v56, %v1248_v32 }
 0x279   : > { %v3561_v54 = vadd.f32 %v1275_v16, %v3419_v51 }
 0x27c   : > { %v1640_v53 = vpop.f32.mrf.mxu0 }
 0x27d   : > { %v1641_v39 = vadd.f32 %v1640_v53, %v1474_v63 }
 0x27f   : > { %v1690_v44 = vmax.f32 %v1641_v39, 0.0 }
 0x283   : > { %v1675_v23 = vpop.f32.mrf.mxu3 }
 0x284   : > { %v1642_v0 = vpop.f32.mrf.mxu0  ;;  %v1676_v28 = vadd.f32 %v1675_v23, %v3361_v45 }
 0x285   : > { %v1643_v25 = vadd.f32 %v1642_v0, %v1479_v46 }
 0x286   : > { %v1704_v46 = vmax.f32 %v1676_v28, 0.0  ;;  %v2215_v28 = vld [vmem:[%s3856_s7 + $0x18] sm:$0xf0] }
 0x287   : > { %v1691_v33 = vmax.f32 %v1643_v25, 0.0 }
 0x289   : > { %v3563_v42 = vpack.c.bf16 %v1691_v33, %v1690_v44 }
 0x28b   : > { %v1677_v2 = vpop.f32.mrf.mxu3 }
 0x28c   : > { %v1645_v48 = vpop.f32.mrf.mxu0  ;;  %v1678_v51 = vadd.f32 %v1677_v2, %v3498_v11 }
 0x28d   : > { %v1646_v27 = vadd.f32 %v1645_v48, %v1484_v55 }
 0x28e   : > { %v1705_v57 = vmax.f32 %v1678_v51, 0.0 }
 0x28f   : > { %v1692_v3 = vmax.f32 %v1646_v27, 0.0 }
 0x290   : > { %v1733_v15 = vpack.c.bf16 %v1705_v57, %v1704_v46  ;;  %v2292_v46 = vld [vmem:[%s3856_s7 + $0x24] sm:$0xf]  ;;  %v2223_v57 = vld [vmem:[%s3856_s7 + $0x28] sm:$0xf0] }
 0x292   : > { %1929 = vmatpush.bf16.msra.mxu1 %v1733_v15  ;;  %2312 = vmatpush.bf16.msrb.mxu3 %v1733_v15 }
 0x293   : > { %v1680_v62 = vpop.f32.mrf.mxu3 }
 0x294   : > { %v1647_v37 = vpop.f32.mrf.mxu0  ;;  %v1681_v23 = vadd.f32 %v1680_v62, %v3410_v34  ;;  %v2207_v34 = vld [vmem:[%s3856_s7 + $0x8] sm:$0xf0] }
 0x295   : > { %v1648_v12 = vadd.f32 %v1647_v37, %v3474_v14 }
 0x296   : > { %v1706_v48 = vmax.f32 %v1681_v23, 0.0 }
 0x297   : > { %v1693_v63 = vmax.f32 %v1648_v12, 0.0  ;;  %v2290_v12 = vld [vmem:[%s3856_s7 + $0x14] sm:$0xf] }
 0x299   : > { %v3568_v22 = vpack.c.bf16 %v1693_v63, %v1692_v3  ;;  %v2218_v3 = vor.u32 %v2290_v12, %v2215_v28  ;;  %v2298_v28 = vld [vmem:[%s3856_s7 + $0x54] sm:$0xf] }
 0x29b   : > { %v1682_v26 = vpop.f32.mrf.mxu3 }
 0x29c   : > { %v1650_v49 = vpop.f32.mrf.mxu0  ;;  %v1683_v0 = vadd.f32 %v1682_v26, %v3520_v50 }
 0x29d   : > { %v1651_v55 = vadd.f32 %v1650_v49, %v3455_v18  ;;  %v2226_v49 = vor.u32 %v2292_v46, %v2223_v57  ;;  %v1742_v46 = vld [vmem:[%s3857_s8 + $0x30] sm:$0xff]  ;;  %v1736_v57 = vld [vmem:[%s3857_s8] sm:$0xff] }
 0x29e   : > { %v1707_v18 = vmax.f32 %v1683_v0, 0.0  ;;  %1754 = vperm.xlu2 %2382, %v1736_v57  }
 0x29f   : > { %v1694_v53 = vmax.f32 %v1651_v55, 0.0  ;;  %v2294_v55 = vld [vmem:[%s3856_s7 + $0x34] sm:$0xf] }
 0x2a3   : > { %v1685_v32 = vpop.f32.mrf.mxu3 }
 0x2a4   : > { %v1652_v16 = vpop.f32.mrf.mxu0  ;;  %v1686_v11 = vadd.f32 %v1685_v32, %v3479_v29  ;;  %v2288_v29 = vld [vmem:[%s3856_s7 + $0x4] sm:$0xf]  ;;  %v2231_v32 = vld [vmem:[%s3856_s7 + $0x38] sm:$0xf0] }
 0x2a5   : > { %v1653_v14 = vadd.f32 %v1652_v16, %v1499_v20  ;;  %v1734_v20 = vpack.c.bf16 %v1707_v18, %v1706_v48  ;;  %v2210_v62 = vor.u32 %v2288_v29, %v2207_v34  ;;  %v2296_v29 = vld [vmem:[%s3856_s7 + $0x44] sm:$0xf] }
 0x2a6   : > { %v1708_v44 = vmax.f32 %v1686_v11, 0.0  ;;  %v2234_v11 = vor.u32 %v2294_v55, %v2231_v32  ;;  %v2291_v55 = vld [vmem:[%s3856_s7 + $0x14] sm:$0xf0] }
 0x2a7   : > { %v1695_v45 = vmax.f32 %v1653_v14, 0.0 }
 0x2a9   : > { %v3572_v39 = vpack.c.bf16 %v1695_v45, %v1694_v53 }
 0x2ab   : > { %v1687_v25 = vpop.f32.mrf.mxu3 }
 0x2ac   : > { %v1688_v33 = vadd.f32 %v1687_v25, %v3389_v52  ;;  %v1655_v2 = vpop.f32.mrf.mxu0 }
 0x2ae   : > { %v1709_v27 = vmax.f32 %v1688_v33, 0.0 }
 0x2b0   : > { %v1735_v37 = vpack.c.bf16 %v1709_v27, %v1708_v44 }
 0x2b2   : > { %1984 = vmatpush.bf16.msra.mxu2 %v1735_v37  ;;  %v1656_v37 = vadd.f32 %v1655_v2, %v3525_v7  ;;  %v1737_v7 = vld [vmem:[%s3857_s8 + $0x8] sm:$0xff]  ;;  %v1738_v2 = vld [vmem:[%s3857_s8 + $0x10] sm:$0xff] }
 0x2b3   : > { %1759 = vperm.xlu0 %2383, %v1737_v7   ;;  %1764 = vperm.xlu1 %2384, %v1738_v2  }
 0x2b4   : > { %v1657_v50 = vpop.f32.mrf.mxu0  ;;  %v1696_v34 = vmax.f32 %v1656_v37, 0.0  ;;  %v1750_v37 = vld [vmem:[%s3857_s8 + $0x70] sm:$0xff] }
 0x2b6   : > { %1985 = vmatpush.bf16.msra.mxu2 %v1734_v20 }
 0x2b9   : > { %2267 = vmatmul.msk.bf16.vlgmr.msra.gmra.mxu2 %vm1904_vm0, %v2210_v62  ;;  %v2205_v62 = vld [vmem:[%s3856_s7] sm:$0xf] }
 0x2bb   : > { %1784 = vperm.xlu0 %2383, %v1742_v46   ;;  %v3747_v46 = vpop.permute.xlu2 %1251 }
 0x2bc   : > { %v1660_v52 = vpop.f32.mrf.mxu0 }
 0x2bd   : > { %v1661_v18 = vadd.f32 %v1660_v52, %v3500_v5  ;;  %v2239_v5 = vld [vmem:[%s3856_s7 + $0x48] sm:$0xf0]  ;;  %v2289_v52 = vld [vmem:[%s3856_s7 + $0x4] sm:$0xf0] }
 0x2be   : > { %v2206_v12 = vor.u32 %v2289_v52, %v2205_v62  ;;  %v2245_v62 = vld [vmem:[%s3856_s7 + $0x50] sm:$0xf]  ;;  %v2299_v52 = vld [vmem:[%s3856_s7 + $0x54] sm:$0xf0] }
 0x2c4   : > { %v1662_v51 = vpop.f32.mrf.mxu0 }
 0x2c5   : > { %v1663_v44 = vadd.f32 %v1662_v51, %v3438_v1  ;;  %v2303_v51 = vld [vmem:[%s3856_s7 + $0x74] sm:$0xf0] }
 0x2c9   : > { %2268 = vmatmul.msk.bf16.gmra.mxu2 %vm1904_vm0, %v2218_v3 }
 0x2cc   : > { %v1665_v63 = vpop.f32.mrf.mxu0 }
 0x2cd   : > { %v1666_v23 = vadd.f32 %v1665_v63, %v3515_v47  ;;  %v1698_v47 = vmax.f32 %v1661_v18, 0.0  ;;  %v2263_v18 = vld [vmem:[%s3856_s7 + $0x78] sm:$0xf0] }
 0x2cf   : > { %v1700_v27 = vmax.f32 %v1666_v23, 0.0  ;;  %v1751_v23 = vld [vmem:[%s3857_s8 + $0x78] sm:$0xff] }
 0x2d4   : > { %v1667_v26 = vpop.f32.mrf.mxu0 }
 0x2d5   : > { %v1668_v53 = vadd.f32 %v1667_v26, %v3490_v41  ;;  %v1699_v41 = vmax.f32 %v1663_v44, 0.0  ;;  %v1745_v26 = vld [vmem:[%s3857_s8 + $0x48] sm:$0xff] }
 0x2d6   : > { %1799 = vperm.xlu0 %2383, %v1745_v26   ;;  %v2293_v44 = vld [vmem:[%s3856_s7 + $0x24] sm:$0xf0] }
 0x2d7   : > { %v1701_v33 = vmax.f32 %v1668_v53, 0.0  ;;  %v1730_v1 = vpack.c.bf16 %v1699_v41, %v1698_v47  ;;  %v1743_v41 = vld [vmem:[%s3857_s8 + $0x38] sm:$0xff]  ;;  %v2229_v47 = vld [vmem:[%s3856_s7 + $0x30] sm:$0xf] }
 0x2d9   : > { %2269 = vmatmul.msk.bf16.gmra.mxu2 %vm1904_vm0, %v2226_v49  ;;  %v1739_v49 = vld [vmem:[%s3857_s8 + $0x18] sm:$0xff] }
 0x2da   : > { %1769 = vperm.xlu2 %2382, %v1739_v49  }
 0x2dc   : > { %v1670_v15 = vpop.f32.mrf.mxu0 }
 0x2dd   : > { %v1671_v16 = vadd.f32 %v1670_v15, %v3459_v61  ;;  %v1658_v61 = vadd.f32 %v1657_v50, %v3507_v19  ;;  %v2242_v50 = vor.u32 %v2296_v29, %v2239_v5  ;;  %v2213_v15 = vld [vmem:[%s3856_s7 + $0x10] sm:$0xf]  ;;  %v1749_v29 = vld [vmem:[%s3857_s8 + $0x68] sm:$0xff] }
 0x2de   : > { %v2214_v32 = vor.u32 %v2291_v55, %v2213_v15  ;;  %v1256_v55 = vpop.permute.xlu0 %1255 }
 0x2df   : > { %v1702_v0 = vmax.f32 %v1671_v16, 0.0  ;;  %v1697_v20 = vmax.f32 %v1658_v61, 0.0  ;;  %v2300_v16 = vld [vmem:[%s3856_s7 + $0x64] sm:$0xf]  ;;  %v1747_v61 = vld [vmem:[%s3857_s8 + $0x58] sm:$0xff] }
 0x2e1   : > { %v1729_v19 = vpack.c.bf16 %v1697_v20, %v1696_v34  ;;  %v2295_v20 = vld [vmem:[%s3856_s7 + $0x34] sm:$0xf0]  ;;  %v2237_v34 = vld [vmem:[%s3856_s7 + $0x40] sm:$0xf] }
 0x2e4   : > { %v1672_v14 = vpop.f32.mrf.mxu0 }
 0x2e5   : > { %v1673_v45 = vadd.f32 %v1672_v14, %v3505_v40  ;;  %v1731_v40 = vpack.c.bf16 %v1701_v33, %v1700_v27  ;;  %v2255_v14 = vld [vmem:[%s3856_s7 + $0x68] sm:$0xf0] }
 0x2e6   : > { %v2258_v53 = vor.u32 %v2300_v16, %v2255_v14 }
 0x2e7   : > { %v1703_v25 = vmax.f32 %v1673_v45, 0.0  ;;  %v1748_v45 = vld [vmem:[%s3857_s8 + $0x60] sm:$0xff] }
 0x2e8   : > { %1814 = vperm.xlu0 %2383, %v1748_v45  }
 0x2e9   : > { %2270 = vmatmul.msk.bf16.gmra.mxu2 %vm1904_vm0, %v2234_v11  ;;  %v1732_v48 = vpack.c.bf16 %v1703_v25, %v1702_v0  ;;  %v1741_v11 = vld [vmem:[%s3857_s8 + $0x28] sm:$0xff]  ;;  %v1744_v0 = vld [vmem:[%s3857_s8 + $0x40] sm:$0xff] }
 0x2ea   : > { %1779 = vperm.xlu2 %2382, %v1741_v11   ;;  %v2221_v25 = vld [vmem:[%s3856_s7 + $0x20] sm:$0xf] }
 0x2eb   : > { %1930 = vmatpush.bf16.msra.mxu1 %v1732_v48  ;;  %2313 = vmatpush.bf16.msrb.mxu3 %v1732_v48  ;;  %v2222_v33 = vor.u32 %v2293_v44, %v2221_v25  ;;  %v2302_v48 = vld [vmem:[%s3856_s7 + $0x74] sm:$0xf]  ;;  %v1264_v25 = vmul.f32 %v3155_v56, %v3540_v60 }
 0x2ec   : > { %v2266_v27 = vor.u32 %v2302_v48, %v2263_v18  ;;  %v1260_v48 = vpop.permute.xlu1 %1259  ;;  %v3962_v18 = vld [vmem:[#allocation46_spill] sm:$0xff] }
 0x2ef   : > { %1931 = vmatpush.bf16.msra.mxu1 %v1731_v40  ;;  %2314 = vmatpush.bf16.msrb.mxu3 %v1731_v40  ;;  %v1746_v40 = vld [vmem:[%s3857_s8 + $0x50] sm:$0xff] }
 0x2f0   : > { %1829 = vperm.xlu0 %2383, %v1751_v23  }
 0x2f2   : > { %1794 = vperm.xlu2 %2382, %v1744_v0  }
 0x2f3   : > { %1932 = vmatpush.bf16.msra.mxu1 %v1730_v1  ;;  %2315 = vmatpush.bf16.msrb.mxu3 %v1730_v1  ;;  %v2230_v1 = vor.u32 %v2295_v20, %v2229_v47 }
 0x2f7   : > { %1933 = vmatpush.bf16.msra.mxu1 %v1729_v19  ;;  %2316 = vmatpush.bf16.msrb.mxu3 %v1729_v19  ;;  %v2297_v19 = vld [vmem:[%s3856_s7 + $0x44] sm:$0xf0] }
 0x2f8   : > { %v1755_v26 = vpop.permute.xlu2 %1754 }
 0x2f9   : > { %2271 = vmatmul.msk.bf16.gmra.mxu2 %vm1904_vm0, %v2242_v50  ;;  %v2238_v50 = vor.u32 %v2297_v19, %v2237_v34 }
 0x2fa   : > { %1809 = vperm.xlu2 %2382, %v1747_v61  }
 0x2fb   : > { %1934 = vmatpush.bf16.msra.mxu1 %v3572_v39  ;;  %2317 = vmatpush.bf16.msrb.mxu3 %v3572_v39  ;;  %v2247_v39 = vld [vmem:[%s3856_s7 + $0x58] sm:$0xf0] }
 0x2fc   : > { %v2250_v3 = vor.u32 %v2298_v28, %v2247_v39 }
 0x2ff   : > { %1935 = vmatpush.bf16.msra.mxu1 %v3568_v22  ;;  %2318 = vmatpush.bf16.msrb.mxu3 %v3568_v22  ;;  %v2261_v22 = vld [vmem:[%s3856_s7 + $0x70] sm:$0xf] }
 0x300   : > { %v2262_v63 = vor.u32 %v2303_v51, %v2261_v22  ;;  %v2253_v22 = vld [vmem:[%s3856_s7 + $0x60] sm:$0xf]  ;;  %v2301_v51 = vld [vmem:[%s3856_s7 + $0x64] sm:$0xf0] }
 0x302   : > { %1824 = vperm.xlu2 %2382, %v1750_v37   ;;  %v1265_v37 = vmul.f32 %v3155_v56, %v3527_v58 }
 0x303   : > { %1936 = vmatpush.bf16.msra.mxu1 %v3563_v42  ;;  %2319 = vmatpush.bf16.msrb.mxu3 %v3563_v42  ;;  %v1740_v42 = vld [vmem:[%s3857_s8 + $0x20] sm:$0xff] }
 0x304   : > { %1774 = vperm.xlu1 %2384, %v1740_v42   ;;  %v1281_v19 = vadd.f32 %v1265_v37, %v3179_v9 }
 0x306   : > { %1937 = vmatmul.bf16.vlgmr.msra.gmra.mxu1 %v2206_v12  ;;  %1972 = vmatmul.bf16.vlgmr.msrb.gmra.mxu3 %v2262_v63  ;;  %v2246_v12 = vor.u32 %v2299_v52, %v2245_v62  ;;  %v1393_v52 = vmax.f32 %v1281_v19, 0.0 }
 0x309   : > { %2272 = vmatmul.msk.bf16.gmra.mxu2 %vm1904_vm0, %v2250_v3  ;;  %v2254_v3 = vor.u32 %v2301_v51, %v2253_v22 }
 0x30c   : > { %1789 = vperm.xlu1 %2384, %v1743_v41  }
 0x314   : > { %1804 = vperm.xlu1 %2384, %v1746_v40  }
 0x316   : > { %1942 = vmatmul.bf16.gmra.mxu1 %v2214_v32  ;;  %v1263_v32 = vmul.f32 %v3155_v56, %v3488_v59 }
 0x318   : > { %v1279_v14 = vadd.f32 %v1263_v32, %v3134_v31 }
 0x319   : > { %2273 = vmatmul.msk.bf16.gmra.mxu2 %vm1904_vm0, %v2258_v53 }
 0x31a   : > { %v1391_v0 = vmax.f32 %v1279_v14, 0.0 }
 0x31c   : > { %1819 = vperm.xlu1 %2384, %v1749_v29  }
 0x325   : > { %v1760_v23 = vpop.permute.xlu0 %1759 }
 0x326   : > { %1947 = vmatmul.bf16.gmra.mxu1 %v2222_v33 }
 0x329   : > { %2274 = vmatmul.msk.bf16.gmra.mxu2 %vm1904_vm0, %v2266_v27  ;;  %v1280_v27 = vadd.f32 %v1264_v25, %v3962_v18 }
 0x32b   : > { %v1392_v47 = vmax.f32 %v1280_v27, 0.0 }
 0x32d   : > { %v3772_v60 = vpop.permute.xlu0 %1784 }
 0x334   : > { %v1770_v15 = vpop.permute.xlu2 %1769 }
 0x336   : > { %1952 = vmatmul.bf16.gmra.mxu1 %v2230_v1  ;;  %v1765_v1 = vpop.permute.xlu1 %1764 }
 0x33c   : > { %v1987_v5 = vpop.f32.mrf.mxu2 }
 0x344   : > { %v1989_v7 = vpop.f32.mrf.mxu2  ;;  %v1780_v33 = vpop.permute.xlu2 %1779 }
 0x346   : > { %1957 = vmatmul.bf16.gmra.mxu1 %v2238_v50 }
 0x348   : > { %v3784_v22 = vpop.permute.xlu0 %1799 }
 0x34c   : > { %v1992_v2 = vpop.f32.mrf.mxu2 }
 0x354   : > { %v1994_v28 = vpop.f32.mrf.mxu2 }
 0x356   : > { %1962 = vmatmul.bf16.gmra.mxu1 %v2246_v12  ;;  %v1266_v12 = vmul.f32 %v3155_v56, %v3549_v4 }
 0x35c   : > { %v3737_v39 = vpop.f32.mrf.mxu2 }
 0x364   : > { %v3745_v63 = vpop.f32.mrf.mxu2 }
 0x366   : > { %1967 = vmatmul.bf16.gmra.mxu1 %v2254_v3 }
 0x36c   : > { %v3749_v57 = vpop.f32.mrf.mxu2 }
 0x374   : > { %v3751_v42 = vpop.f32.mrf.mxu2 }
 0x37c   : > { %v3753_v49 = vpop.f32.mrf.mxu2 }
 0x383   : > { %v1938_v16 = vpop.f32.mrf.mxu1 }
 0x384   : > { %v1939_v53 = vadd.f32 %v1938_v16, %v1755_v26  ;;  %v3758_v45 = vpop.f32.mrf.mxu2  ;;  %v1282_v26 = vadd.f32 %v1266_v12, %v3157_v24 }
 0x386   : > { %v1988_v11 = vadd.f32 %v1987_v5, %v1939_v53  ;;  %v3776_v5 = vpop.permute.xlu2 %1794 }
 0x388   : > { %v2027_v44 = vmax.f32 %v1988_v11, 0.0  ;;  %v1775_v11 = vpop.permute.xlu1 %1774 }
 0x389   : > { %v1973_v24 = vpop.f32.mrf.mxu3 }
 0x38a   : > { %v2043_v31 = vadd.f32 %v2027_v44, %v1391_v0  ;;  %v3792_v0 = vpop.permute.xlu0 %1814 }
 0x38b   : > { %v1940_v59 = vpop.f32.mrf.mxu1 }
 0x38c   : > { %2059 = vst [vmem:[%s3766_s20] sm:$0xff] %v2043_v31  ;;  %v1941_v61 = vadd.f32 %v1940_v59, %v1760_v23  ;;  %v3770_v41 = vpop.f32.mrf.mxu2  ;;  %v1277_v59 = vmul.f32 %v3155_v56, %v1256_v55  ;;  %v1278_v55 = vmul.f32 %v3155_v56, %v1260_v48 }
 0x38e   : > { %v1990_v40 = vadd.f32 %v1989_v7, %v1941_v61  ;;  %v3790_v16 = vpop.permute.xlu2 %1809 }
 0x390   : > { %v2028_v20 = vmax.f32 %v1990_v40, 0.0  ;;  %v1293_v40 = vadd.f32 %v1277_v59, %v3486_v13 }
 0x392   : > { %v2044_v29 = vadd.f32 %v2028_v20, %v1392_v47  ;;  %v1405_v19 = vmax.f32 %v1293_v40, 0.0 }
 0x393   : > { %v1943_v34 = vpop.f32.mrf.mxu1 }
 0x394   : > { %2060 = vst [vmem:[%s3766_s20 + $0x8] sm:$0xff] %v2044_v29  ;;  %v1944_v50 = vadd.f32 %v1943_v34, %v1765_v1  ;;  %v3780_v62 = vpop.f32.mrf.mxu2  ;;  %v1975_v34 = vpop.f32.mrf.mxu3 }
 0x396   : > { %v1993_v7 = vadd.f32 %v1992_v2, %v1944_v50  ;;  %v1394_v2 = vmax.f32 %v1282_v26, 0.0  ;;  %v1825_v31 = vpop.permute.xlu2 %1824  ;;  %v1396_v50 = vmax.f32 %v3503_v30, 0.0 }
 0x397   : > { %v1974_v27 = vadd.f32 %v1973_v24, %v1825_v31  ;;  %v1399_v31 = vmax.f32 %v3510_v17, 0.0 }
 0x398   : > { %v2029_v58 = vmax.f32 %v1993_v7, 0.0 }
 0x39a   : > { %v2045_v51 = vadd.f32 %v2029_v58, %v1393_v52 }
 0x39b   : > { %v1945_v3 = vpop.f32.mrf.mxu1 }
 0x39c   : > { %2061 = vst [vmem:[%s3766_s20 + $0x10] sm:$0xff] %v2045_v51  ;;  %v1946_v32 = vadd.f32 %v1945_v3, %v1770_v15  ;;  %v3788_v9 = vpop.f32.mrf.mxu2 }
 0x39e   : > { %v1995_v14 = vadd.f32 %v1994_v28, %v1946_v32  ;;  %v1395_v28 = vmax.f32 %v3531_v38, 0.0  ;;  %v1397_v32 = vmax.f32 %v3553_v35, 0.0 }
 0x3a0   : > { %v2030_v53 = vmax.f32 %v1995_v14, 0.0 }
 0x3a2   : > { %v2046_v23 = vadd.f32 %v2030_v53, %v1394_v2  ;;  %v1790_v53 = vpop.permute.xlu1 %1789 }
 0x3a3   : > { %v1948_v4 = vpop.f32.mrf.mxu1 }
 0x3a4   : > { %2062 = vst [vmem:[%s3766_s20 + $0x18] sm:$0xff] %v2046_v23  ;;  %v1949_v25 = vadd.f32 %v1948_v4, %v1775_v11  ;;  %v3795_v44 = vpop.f32.mrf.mxu2  ;;  %v1398_v4 = vmax.f32 %v3538_v43, 0.0 }
 0x3a6   : > { %v1998_v15 = vadd.f32 %v3737_v39, %v1949_v25  ;;  %v1830_v39 = vpop.permute.xlu0 %1829 }
 0x3a7   : > { %v1976_v13 = vadd.f32 %v1975_v34, %v1830_v39 }
 0x3a8   : > { %v2031_v18 = vmax.f32 %v1998_v15, 0.0 }
 0x3aa   : > { %v2047_v61 = vadd.f32 %v2031_v18, %v1395_v28 }
 0x3ab   : > { %v1950_v37 = vpop.f32.mrf.mxu1 }
 0x3ac   : > { %2063 = vst [vmem:[%s3766_s20 + $0x20] sm:$0xff] %v2047_v61  ;;  %v1951_v47 = vadd.f32 %v1950_v37, %v1780_v33  ;;  %v2022_v20 = vpop.f32.mrf.mxu2  ;;  %v1294_v33 = vadd.f32 %v1278_v55, %v3445_v36  ;;  %v1805_v37 = vpop.permute.xlu1 %1804  ;;  %v1276_v55 = vmul.f32 %v3155_v56, %v3747_v46 }
 0x3ad   : > { %v2023_v1 = vadd.f32 %v2022_v20, %v1974_v27  ;;  %v1400_v27 = vmax.f32 %v3557_v21, 0.0 }
 0x3ae   : > { %v2000_v29 = vadd.f32 %v3745_v63, %v1951_v47  ;;  %v1406_v26 = vmax.f32 %v1294_v33, 0.0  ;;  %v1401_v47 = vmax.f32 %v3544_v6, 0.0 }
 0x3af   : > { %v2041_v38 = vmax.f32 %v2023_v1, 0.0 }
 0x3b0   : > { %v2032_v7 = vmax.f32 %v2000_v29, 0.0 }
 0x3b1   : > { %v2057_v52 = vadd.f32 %v2041_v38, %v1405_v19  ;;  %v1403_v38 = vmax.f32 %v3561_v54, 0.0 }
 0x3b2   : > { %v2048_v12 = vadd.f32 %v2032_v7, %v1396_v50 }
 0x3b3   : > { %2073 = vst [vmem:[%s3766_s20 + $0x70] sm:$0xff] %v2057_v52  ;;  %v1953_v58 = vpop.f32.mrf.mxu1 }
 0x3b4   : > { %2064 = vst [vmem:[%s3766_s20 + $0x28] sm:$0xff] %v2048_v12  ;;  %v1954_v63 = vadd.f32 %v1953_v58, %v3772_v60  ;;  %v2024_v51 = vpop.f32.mrf.mxu2  ;;  %v1820_v7 = vpop.permute.xlu1 %1819 }
 0x3b5   : > { %v2025_v3 = vadd.f32 %v2024_v51, %v1976_v13 }
 0x3b6   : > { %v2003_v48 = vadd.f32 %v3749_v57, %v1954_v63 }
 0x3b7   : > { %v2042_v30 = vmax.f32 %v2025_v3, 0.0 }
 0x3b8   : > { %v2033_v14 = vmax.f32 %v2003_v48, 0.0 }
 0x3b9   : > { %v2058_v2 = vadd.f32 %v2042_v30, %v1406_v26 }
 0x3ba   : > { %v2049_v11 = vadd.f32 %v2033_v14, %v1397_v32 }
 0x3bb   : > { %2074 = vst [vmem:[%s3766_s20 + $0x78] sm:$0xff] %v2058_v2  ;;  %v1955_v36 = vpop.f32.mrf.mxu1 }
 0x3bc   : > { %2065 = vst [vmem:[%s3766_s20 + $0x30] sm:$0xff] %v2049_v11  ;;  %v1956_v23 = vadd.f32 %v1955_v36, %v1790_v53 }
 0x3be   : > { %v2005_v60 = vadd.f32 %v3751_v42, %v1956_v23 }
 0x3c0   : > { %v2034_v25 = vmax.f32 %v2005_v60, 0.0 }
 0x3c2   : > { %v2050_v57 = vadd.f32 %v2034_v25, %v1398_v4 }
 0x3c3   : > { %v1958_v24 = vpop.f32.mrf.mxu1 }
 0x3c4   : > { %2066 = vst [vmem:[%s3766_s20 + $0x38] sm:$0xff] %v2050_v57  ;;  %v1959_v35 = vadd.f32 %v1958_v24, %v3776_v5 }
 0x3c6   : > { %v2008_v15 = vadd.f32 %v3753_v49, %v1959_v35 }
 0x3c8   : > { %v2035_v59 = vmax.f32 %v2008_v15, 0.0 }
 0x3ca   : > { %v2051_v28 = vadd.f32 %v2035_v59, %v1399_v31 }
 0x3cb   : > { %v1960_v18 = vpop.f32.mrf.mxu1 }
 0x3cc   : > { %2067 = vst [vmem:[%s3766_s20 + $0x40] sm:$0xff] %v2051_v28  ;;  %v1961_v42 = vadd.f32 %v1960_v18, %v3784_v22 }
 0x3ce   : > { %v2010_v43 = vadd.f32 %v3758_v45, %v1961_v42  ;;  %v1402_v45 = vmax.f32 %v3518_v10, 0.0  ;;  %v1292_v10 = vadd.f32 %v1276_v55, %v3339_v8 }
 0x3d0   : > { %v2036_v61 = vmax.f32 %v2010_v43, 0.0  ;;  %v1404_v12 = vmax.f32 %v1292_v10, 0.0 }
 0x3d2   : > { %v2052_v40 = vadd.f32 %v2036_v61, %v1400_v27 }
 0x3d3   : > { %v1963_v5 = vpop.f32.mrf.mxu1 }
 0x3d4   : > { %2068 = vst [vmem:[%s3766_s20 + $0x48] sm:$0xff] %v2052_v40  ;;  %v1964_v49 = vadd.f32 %v1963_v5, %v1805_v37 }
 0x3d6   : > { %v2013_v17 = vadd.f32 %v3770_v41, %v1964_v49 }
 0x3d8   : > { %v2037_v20 = vmax.f32 %v2013_v17, 0.0 }
 0x3da   : > { %v2053_v1 = vadd.f32 %v2037_v20, %v1401_v47 }
 0x3db   : > { %v1965_v29 = vpop.f32.mrf.mxu1 }
 0x3dc   : > { %2069 = vst [vmem:[%s3766_s20 + $0x50] sm:$0xff] %v2053_v1  ;;  %v1966_v22 = vadd.f32 %v1965_v29, %v3790_v16 }
 0x3de   : > { %v2015_v21 = vadd.f32 %v3780_v62, %v1966_v22 }
 0x3e0   : > { %v2038_v39 = vmax.f32 %v2015_v21, 0.0 }
 0x3e2   : > { %v2054_v34 = vadd.f32 %v2038_v39, %v1402_v45 }
 0x3e3   : > { %v1968_v19 = vpop.f32.mrf.mxu1 }
 0x3e4   : > { %2070 = vst [vmem:[%s3766_s20 + $0x58] sm:$0xff] %v2054_v34  ;;  %v1969_v41 = vadd.f32 %v1968_v19, %v3792_v0 }
 0x3e6   : > { %v2018_v6 = vadd.f32 %v3788_v9, %v1969_v41 }
 0x3e8   : > { %v2039_v16 = vmax.f32 %v2018_v6, 0.0 }
 0x3ea   : > { %v2055_v50 = vadd.f32 %v2039_v16, %v1403_v38 }
 0x3eb   : > { %v1970_v62 = vpop.f32.mrf.mxu1 }
 0x3ec   : > { %2071 = vst [vmem:[%s3766_s20 + $0x60] sm:$0xff] %v2055_v50  ;;  %v1971_v52 = vadd.f32 %v1970_v62, %v1820_v7 }
 0x3ee   : > { %v2020_v13 = vadd.f32 %v3795_v44, %v1971_v52 }
 0x3f0   : > { %v2040_v33 = vmax.f32 %v2020_v13, 0.0 }
 0x3f2   : > { %v2056_v0 = vadd.f32 %v2040_v33, %v1404_v12 }
 0x3f4   : > { %2072 = vst [vmem:[%s3766_s20 + $0x68] sm:$0xff] %v2056_v0 }
 0x3f5 PF: > { %s19_s11 = sadd.s32 1, %s2418_s11   ;;  %s3963_s30 = smov %s2414_s10 }
 0x3f6   : > { %p16_p5 = scmp.ge.s32.totalorder %s19_s11, 4   ;;  %s3964_s10 = smov %s3966_s12 }
 0x3f8   :  { %18 = sbr.rel (!%p16_p5) target bundleno = 2 (0x2), region = 86 }

</bundles_post_ra>
